<compile_context>
chip_gen: v7x
topology: tpu7x:2x2x1
jax: 0.10.0
libtpu: 0.0.40
codegen_flags: <defaults>
</compile_context>

<pallas_src>
import jax
import jax.numpy as jnp
from jax.experimental import pallas as pl
from jax.experimental.pallas import tpu as pltpu

H = 384          # sentence-transformer hidden size (per module: 384)
H_CAT = 3 * H    # 1152
H_PRE = 768      # pre_classifier output size


def sbert_fused_kernel(sent_ids_ref, doc_ids_ref, sent_mask_ref, doc_mask_ref,
                       table_ref, w1_ref, b1_ref, w2_ref, b2_ref, out_ref):
    table = table_ref[...]                                    # (Vp, H) bf16, VMEM-resident

    def masked_mean_pool(ids_ref, mask_ref):
        ids = ids_ref[...]                                    # (TB, S) int32
        mask = mask_ref[...]                                  # (TB, S) f32
        vp = table.shape[0]
        # Weighted one-hot over the (lane-dense, padded) vocab axis.
        iota_v = jax.lax.broadcasted_iota(jnp.int32, ids.shape + (vp,), 2)
        w_onehot = jnp.where(ids[:, :, None] == iota_v,
                             mask[:, :, None], 0.0)           # (TB, S, Vp) f32
        counts = jnp.sum(w_onehot, axis=1)                    # (TB, Vp) f32
        # Gather + masked sum fused into one small MXU matmul (f32 accumulate).
        summed = jnp.dot(counts.astype(jnp.bfloat16), table,
                         preferred_element_type=jnp.float32)  # (TB, H) f32
        denom = jnp.maximum(jnp.sum(mask, axis=1, keepdims=True), 1e-9)  # clamp(min=1e-9)
        # Divide -> EUP reciprocal + VPU multiply (EUP slot is otherwise idle).
        return summed * pl.reciprocal(denom, approx=True)

    sent_pool = masked_mean_pool(sent_ids_ref, sent_mask_ref)  # (TB, H) f32
    doc_pool = masked_mean_pool(doc_ids_ref, doc_mask_ref)     # (TB, H) f32
    combined = sent_pool * doc_pool                            # (TB, H) f32

    # feat_cat = concat([sent_pool, doc_pool, combined], axis=1)  (TB, 3H)
    # pre_classifier: feat_cat @ W1 + b1 — three partial MXU matmuls against
    # statically-sliced row blocks of the VMEM-resident bf16 w1 ref (avoids a
    # lane-axis concat and never stages all of w1 as one live value).
    sp = sent_pool.astype(jnp.bfloat16)
    dp = doc_pool.astype(jnp.bfloat16)
    cb = combined.astype(jnp.bfloat16)
    pooler = (
        jnp.dot(sp, w1_ref[0:H, :], preferred_element_type=jnp.float32)
        + jnp.dot(dp, w1_ref[H:2 * H, :], preferred_element_type=jnp.float32)
        + jnp.dot(cb, w1_ref[2 * H:3 * H, :], preferred_element_type=jnp.float32)
        + b1_ref[...]
    )                                                          # (TB, 768) f32
    pooler = jnp.maximum(pooler, 0.0)                          # ReLU
    # Dropout(0.3) -> identity at inference.

    # classifier: Linear(768, 1). N=1 matmul wastes the MXU; do it as a VPU
    # multiply + lane reduction against the lane-dense (1, 768) weight.
    logits = jnp.sum(pooler * w2_ref[...], axis=-1, keepdims=True) + b2_ref[...]
    out_ref[...] = jax.nn.sigmoid(logits)                      # (TB, 1) f32


def _choose_tile_b(B, S, vocab_pad, vmem_budget_bytes=16 * 1024 * 1024):
    # Dominant live intermediate: 2 encoders x (TB, S, Vp) f32 weighted one-hot.
    per_row = 2 * S * vocab_pad * 4
    tb = max(1, vmem_budget_bytes // per_row)
    tb = min(tb, 256, B)
    if tb >= 8:
        tb = (tb // 8) * 8        # sublane-aligned tile
    else:
        tb = B if B <= 8 else 8   # tiny batch: one full block
    return tb


def sbert_forward(sent_ids, doc_ids, sent_mask, doc_mask, params):
    # "Backbone" stand-in = embedding lookup, fused into the kernel as a
    # weighted-one-hot x table MXU matmul (no (B, S, H) HBM round trip).
    table = params["embed_table"]
    V = table.shape[0]
    vp = max(128, pl.cdiv(V, 128) * 128)
    if vp != V:
        table = jnp.pad(table, ((0, vp - V), (0, 0)))

    B, S = sent_ids.shape
    tb = _choose_tile_b(B, S, vp)
    b_padded = pl.cdiv(B, tb) * tb
    if b_padded != B:
        pad = b_padded - B
        sent_ids = jnp.pad(sent_ids, ((0, pad), (0, 0)))
        doc_ids = jnp.pad(doc_ids, ((0, pad), (0, 0)))
        sent_mask = jnp.pad(sent_mask, ((0, pad), (0, 0)))
        doc_mask = jnp.pad(doc_mask, ((0, pad), (0, 0)))

    ids_spec = pl.BlockSpec((tb, S), lambda i: (i, 0))
    mask_spec = pl.BlockSpec((tb, S), lambda i: (i, 0))
    # Table / weights / biases: constant block index -> fetched once, VMEM-resident.
    table_spec = pl.BlockSpec((vp, H), lambda i: (0, 0))
    w1_spec = pl.BlockSpec((H_CAT, H_PRE), lambda i: (0, 0))
    b1_spec = pl.BlockSpec((1, H_PRE), lambda i: (0, 0))
    w2_spec = pl.BlockSpec((1, H_PRE), lambda i: (0, 0))
    b2_spec = pl.BlockSpec((1, 1), lambda i: (0, 0))
    out_spec = pl.BlockSpec((tb, 1), lambda i: (i, 0))

    out = pl.pallas_call(
        sbert_fused_kernel,
        out_shape=jax.ShapeDtypeStruct((b_padded, 1), jnp.float32),
        grid=(b_padded // tb,),
        in_specs=[ids_spec, ids_spec, mask_spec, mask_spec,
                  table_spec, w1_spec, b1_spec, w2_spec, b2_spec],
        out_specs=out_spec,
        compiler_params=pltpu.CompilerParams(
            dimension_semantics=("parallel",),      # v7x: shard batch over 2 TCs
            vmem_limit_bytes=48 * 1024 * 1024,      # > default scoped, < physical
        ),
    )(sent_ids, doc_ids,
      sent_mask.astype(jnp.float32), doc_mask.astype(jnp.float32),
      table, params["w1"], params["b1"], params["w2"], params["b2"])
    return out[:B]


def forward(sent_ids, doc_ids, sent_mask, doc_mask, params):
    return sbert_forward(sent_ids, doc_ids, sent_mask, doc_mask, params)


def init_params(key, vocab_size=100):
    k0, k1, k2, k3, k4 = jax.random.split(key, 5)
    return {
        # backbone stand-in: deterministic embedding table, bf16
        "embed_table": (jax.random.normal(k0, (vocab_size, H), jnp.float32)
                        * 0.02).astype(jnp.bfloat16),
        # pre_classifier: Linear(1152, 768); stored (in, out), bf16 stream
        "w1": (jax.random.normal(k1, (H_CAT, H_PRE), jnp.float32)
               * (1.0 / H_CAT ** 0.5)).astype(jnp.bfloat16),
        "b1": jax.random.normal(k2, (1, H_PRE), jnp.float32) * 0.01,
        # classifier: Linear(768, 1); weight stored lane-dense (1, 768)
        "w2": jax.random.normal(k3, (1, H_PRE), jnp.float32) * (1.0 / H_PRE ** 0.5),
        "b2": jax.random.normal(k4, (1, 1), jnp.float32) * 0.01,
    }


if __name__ == "__main__":
    B, S = 2, 8
    key = jax.random.PRNGKey(0)
    kp, ks, kd = jax.random.split(key, 3)

    params = init_params(kp)
    sent_ids = jax.random.randint(ks, (B, S), 0, 100, dtype=jnp.int32)
    doc_ids = jax.random.randint(kd, (B, S), 0, 100, dtype=jnp.int32)
    # Masks: mask out the last 2 tokens of the second sentence / first doc.
    sent_mask = jnp.ones((B, S), jnp.float32).at[1, S - 2:].set(0.0)
    doc_mask = jnp.ones((B, S), jnp.float32).at[0, S - 2:].set(0.0)

    out = forward(sent_ids, doc_ids, sent_mask, doc_mask, params)
    jax.block_until_ready(out)
    assert out.shape == (B, 1)
    assert bool(jnp.all(jnp.isfinite(out)))
    print("KERNEL_OK")
</pallas_src>

<mosaic_0001>
module attributes {stable_mosaic.version = 11 : i64} {
  func.func @sbert_fused_kernel(%arg0: i32, %arg1: memref<2x8xi32, #tpu.memory_space<vmem>>, %arg2: memref<2x8xi32, #tpu.memory_space<vmem>>, %arg3: memref<2x8xf32, #tpu.memory_space<vmem>>, %arg4: memref<2x8xf32, #tpu.memory_space<vmem>>, %arg5: memref<128x384xbf16, #tpu.memory_space<vmem>>, %arg6: memref<1152x768xbf16, #tpu.memory_space<vmem>>, %arg7: memref<1x768xf32, #tpu.memory_space<vmem>>, %arg8: memref<1x768xf32, #tpu.memory_space<vmem>>, %arg9: memref<1x1xf32, #tpu.memory_space<vmem>>, %arg10: memref<2x1xf32, #tpu.memory_space<vmem>>) attributes {dimension_semantics = [#tpu.dimension_semantics<parallel>], iteration_bounds = array<i64: 1>, scalar_prefetch = 0 : i64, scratch_operands = 0 : i64, tpu.core_type = #tpu.core_type<tc>, window_params = [{transform_indices = @transform_0, window_bounds = array<i64: 2, 8>}, {transform_indices = @transform_1, window_bounds = array<i64: 2, 8>}, {transform_indices = @transform_2, window_bounds = array<i64: 2, 8>}, {transform_indices = @transform_3, window_bounds = array<i64: 2, 8>}, {pipeline_mode = #tpu.pipeline_mode<synchronous>, transform_indices = @transform_4, window_bounds = array<i64: 128, 384>}, {pipeline_mode = #tpu.pipeline_mode<synchronous>, transform_indices = @transform_5, window_bounds = array<i64: 1152, 768>}, {pipeline_mode = #tpu.pipeline_mode<synchronous>, transform_indices = @transform_6, window_bounds = array<i64: 1, 768>}, {pipeline_mode = #tpu.pipeline_mode<synchronous>, transform_indices = @transform_7, window_bounds = array<i64: 1, 768>}, {pipeline_mode = #tpu.pipeline_mode<synchronous>, transform_indices = @transform_8, window_bounds = array<i64: 1, 1>}, {transform_indices = @transform_9, window_bounds = array<i64: 2, 1>}]} {
    %c0 = arith.constant 0 : index
    %c0_0 = arith.constant 0 : index
    %0 = vector.load %arg5[%c0, %c0_0] : memref<128x384xbf16, #tpu.memory_space<vmem>>, vector<128x384xbf16>
    %c0_1 = arith.constant 0 : index
    %c0_2 = arith.constant 0 : index
    %1 = vector.load %arg1[%c0_1, %c0_2] : memref<2x8xi32, #tpu.memory_space<vmem>>, vector<2x8xi32>
    %c0_3 = arith.constant 0 : index
    %c0_4 = arith.constant 0 : index
    %2 = vector.load %arg3[%c0_3, %c0_4] : memref<2x8xf32, #tpu.memory_space<vmem>>, vector<2x8xf32>
    %3 = tpu.iota {dimensions = array<i32: 2>} : vector<2x8x128xi32>
    %4 = vector.shape_cast %1 : vector<2x8xi32> to vector<2x8x1xi32>
    %5 = vector.broadcast %4 : vector<2x8x1xi32> to vector<2x8x128xi32>
    %6 = arith.cmpi eq, %5, %3 : vector<2x8x128xi32>
    %7 = vector.shape_cast %2 : vector<2x8xf32> to vector<2x8x1xf32>
    %cst = arith.constant 0.000000e+00 : f32
    %8 = vector.shape_cast %7 : vector<2x8x1xf32> to vector<2x8x1xf32>
    %9 = vector.broadcast %8 : vector<2x8x1xf32> to vector<2x8x128xf32>
    %10 = vector.broadcast %cst : f32 to vector<2x8x128xf32>
    %11 = arith.select %6, %9, %10 : vector<2x8x128xi1>, vector<2x8x128xf32>
    %cst_5 = arith.constant dense<0.000000e+00> : vector<2x128xf32>
    %12 = vector.multi_reduction <add>, %11, %cst_5 [1] : vector<2x8x128xf32> to vector<2x128xf32>
    %13 = arith.truncf %12 : vector<2x128xf32> to vector<2x128xbf16>
    %cst_6 = arith.constant dense<0.000000e+00> : vector<2x384xf32>
    %14 = tpu.matmul %13, %0, %cst_6 {dimension_numbers = #tpu.dot_dimension_numbers<[1], [0], [0], [1], [0, 0, 1, 1], [], []>} : vector<2x128xbf16>, vector<128x384xbf16>, vector<2x384xf32> -> vector<2x384xf32>
    %cst_7 = arith.constant dense<0.000000e+00> : vector<2xf32>
    %15 = vector.multi_reduction <add>, %2, %cst_7 [1] : vector<2x8xf32> to vector<2xf32>
    %16 = vector.shape_cast %15 : vector<2xf32> to vector<2x1xf32>
    %cst_8 = arith.constant 9.99999971E-10 : f32
    %17 = vector.broadcast %cst_8 : f32 to vector<2x1xf32>
    %18 = arith.maximumf %16, %17 : vector<2x1xf32>
    %19 = tpu.reciprocal %18 {approx = true} : vector<2x1xf32> -> vector<2x1xf32>
    %20 = vector.broadcast %19 : vector<2x1xf32> to vector<2x384xf32>
    %21 = arith.mulf %14, %20 : vector<2x384xf32>
    %c0_9 = arith.constant 0 : index
    %c0_10 = arith.constant 0 : index
    %22 = vector.load %arg2[%c0_9, %c0_10] : memref<2x8xi32, #tpu.memory_space<vmem>>, vector<2x8xi32>
    %c0_11 = arith.constant 0 : index
    %c0_12 = arith.constant 0 : index
    %23 = vector.load %arg4[%c0_11, %c0_12] : memref<2x8xf32, #tpu.memory_space<vmem>>, vector<2x8xf32>
    %24 = tpu.iota {dimensions = array<i32: 2>} : vector<2x8x128xi32>
    %25 = vector.shape_cast %22 : vector<2x8xi32> to vector<2x8x1xi32>
    %26 = vector.broadcast %25 : vector<2x8x1xi32> to vector<2x8x128xi32>
    %27 = arith.cmpi eq, %26, %24 : vector<2x8x128xi32>
    %28 = vector.shape_cast %23 : vector<2x8xf32> to vector<2x8x1xf32>
    %cst_13 = arith.constant 0.000000e+00 : f32
    %29 = vector.shape_cast %28 : vector<2x8x1xf32> to vector<2x8x1xf32>
    %30 = vector.broadcast %29 : vector<2x8x1xf32> to vector<2x8x128xf32>
    %31 = vector.broadcast %cst_13 : f32 to vector<2x8x128xf32>
    %32 = arith.select %27, %30, %31 : vector<2x8x128xi1>, vector<2x8x128xf32>
    %cst_14 = arith.constant dense<0.000000e+00> : vector<2x128xf32>
    %33 = vector.multi_reduction <add>, %32, %cst_14 [1] : vector<2x8x128xf32> to vector<2x128xf32>
    %34 = arith.truncf %33 : vector<2x128xf32> to vector<2x128xbf16>
    %cst_15 = arith.constant dense<0.000000e+00> : vector<2x384xf32>
    %35 = tpu.matmul %34, %0, %cst_15 {dimension_numbers = #tpu.dot_dimension_numbers<[1], [0], [0], [1], [0, 0, 1, 1], [], []>} : vector<2x128xbf16>, vector<128x384xbf16>, vector<2x384xf32> -> vector<2x384xf32>
    %cst_16 = arith.constant dense<0.000000e+00> : vector<2xf32>
    %36 = vector.multi_reduction <add>, %23, %cst_16 [1] : vector<2x8xf32> to vector<2xf32>
    %37 = vector.shape_cast %36 : vector<2xf32> to vector<2x1xf32>
    %cst_17 = arith.constant 9.99999971E-10 : f32
    %38 = vector.broadcast %cst_17 : f32 to vector<2x1xf32>
    %39 = arith.maximumf %37, %38 : vector<2x1xf32>
    %40 = tpu.reciprocal %39 {approx = true} : vector<2x1xf32> -> vector<2x1xf32>
    %41 = vector.broadcast %40 : vector<2x1xf32> to vector<2x384xf32>
    %42 = arith.mulf %35, %41 : vector<2x384xf32>
    %43 = arith.mulf %21, %42 : vector<2x384xf32>
    %44 = arith.truncf %21 : vector<2x384xf32> to vector<2x384xbf16>
    %45 = arith.truncf %42 : vector<2x384xf32> to vector<2x384xbf16>
    %46 = arith.truncf %43 : vector<2x384xf32> to vector<2x384xbf16>
    %c0_18 = arith.constant 0 : index
    %c0_19 = arith.constant 0 : index
    %47 = vector.load %arg6[%c0_18, %c0_19] : memref<1152x768xbf16, #tpu.memory_space<vmem>>, vector<384x768xbf16>
    %cst_20 = arith.constant dense<0.000000e+00> : vector<2x768xf32>
    %48 = tpu.matmul %44, %47, %cst_20 {dimension_numbers = #tpu.dot_dimension_numbers<[1], [0], [0], [1], [0, 0, 1, 1], [], []>} : vector<2x384xbf16>, vector<384x768xbf16>, vector<2x768xf32> -> vector<2x768xf32>
    %c384 = arith.constant 384 : index
    %c0_21 = arith.constant 0 : index
    %49 = vector.load %arg6[%c384, %c0_21] : memref<1152x768xbf16, #tpu.memory_space<vmem>>, vector<384x768xbf16>
    %cst_22 = arith.constant dense<0.000000e+00> : vector<2x768xf32>
    %50 = tpu.matmul %45, %49, %cst_22 {dimension_numbers = #tpu.dot_dimension_numbers<[1], [0], [0], [1], [0, 0, 1, 1], [], []>} : vector<2x384xbf16>, vector<384x768xbf16>, vector<2x768xf32> -> vector<2x768xf32>
    %51 = arith.addf %48, %50 : vector<2x768xf32>
    %c768 = arith.constant 768 : index
    %c0_23 = arith.constant 0 : index
    %52 = vector.load %arg6[%c768, %c0_23] : memref<1152x768xbf16, #tpu.memory_space<vmem>>, vector<384x768xbf16>
    %cst_24 = arith.constant dense<0.000000e+00> : vector<2x768xf32>
    %53 = tpu.matmul %46, %52, %cst_24 {dimension_numbers = #tpu.dot_dimension_numbers<[1], [0], [0], [1], [0, 0, 1, 1], [], []>} : vector<2x384xbf16>, vector<384x768xbf16>, vector<2x768xf32> -> vector<2x768xf32>
    %54 = arith.addf %51, %53 : vector<2x768xf32>
    %c0_25 = arith.constant 0 : index
    %c0_26 = arith.constant 0 : index
    %55 = vector.load %arg7[%c0_25, %c0_26] : memref<1x768xf32, #tpu.memory_space<vmem>>, vector<1x768xf32>
    %56 = vector.broadcast %55 : vector<1x768xf32> to vector<2x768xf32>
    %57 = arith.addf %54, %56 : vector<2x768xf32>
    %cst_27 = arith.constant 0.000000e+00 : f32
    %58 = vector.broadcast %cst_27 : f32 to vector<2x768xf32>
    %59 = arith.maximumf %57, %58 : vector<2x768xf32>
    %c0_28 = arith.constant 0 : index
    %c0_29 = arith.constant 0 : index
    %60 = vector.load %arg8[%c0_28, %c0_29] : memref<1x768xf32, #tpu.memory_space<vmem>>, vector<1x768xf32>
    %61 = vector.broadcast %60 : vector<1x768xf32> to vector<2x768xf32>
    %62 = arith.mulf %59, %61 : vector<2x768xf32>
    %cst_30 = arith.constant dense<0.000000e+00> : vector<2xf32>
    %63 = vector.multi_reduction <add>, %62, %cst_30 [1] : vector<2x768xf32> to vector<2xf32>
    %64 = vector.shape_cast %63 : vector<2xf32> to vector<2x1xf32>
    %c0_31 = arith.constant 0 : index
    %c0_32 = arith.constant 0 : index
    %65 = vector.load %arg9[%c0_31, %c0_32] : memref<1x1xf32, #tpu.memory_space<vmem>>, vector<1x1xf32>
    %66 = vector.broadcast %65 : vector<1x1xf32> to vector<2x1xf32>
    %67 = arith.addf %64, %66 : vector<2x1xf32>
    %68 = arith.negf %67 : vector<2x1xf32>
    %69 = math.exp %68 : vector<2x1xf32>
    %cst_33 = arith.constant 1.000000e+00 : f32
    %70 = vector.broadcast %cst_33 : f32 to vector<2x1xf32>
    %71 = arith.addf %70, %69 : vector<2x1xf32>
    %72 = arith.divf %70, %71 : vector<2x1xf32>
    %c0_34 = arith.constant 0 : index
    %c0_35 = arith.constant 0 : index
    %73 = vector.load %arg10[%c0_34, %c0_35] : memref<2x1xf32, #tpu.memory_space<vmem>>, vector<2x1xf32>
    tpu.vector_store %arg10[%c0_34, %c0_35], %72 {strides = array<i32>} : memref<2x1xf32, #tpu.memory_space<vmem>>, vector<2x1xf32>,
    return
  }
  func.func @transform_0(%arg0: i32) -> (i32, i32) {
    %c0_i32 = arith.constant 0 : i32
    %c0_i32_0 = arith.constant 0 : i32
    return %arg0, %c0_i32 : i32, i32
  }
  func.func @transform_1(%arg0: i32) -> (i32, i32) {
    %c0_i32 = arith.constant 0 : i32
    %c0_i32_0 = arith.constant 0 : i32
    return %arg0, %c0_i32 : i32, i32
  }
  func.func @transform_2(%arg0: i32) -> (i32, i32) {
    %c0_i32 = arith.constant 0 : i32
    %c0_i32_0 = arith.constant 0 : i32
    return %arg0, %c0_i32 : i32, i32
  }
  func.func @transform_3(%arg0: i32) -> (i32, i32) {
    %c0_i32 = arith.constant 0 : i32
    %c0_i32_0 = arith.constant 0 : i32
    return %arg0, %c0_i32 : i32, i32
  }
  func.func @transform_4(%arg0: i32) -> (i32, i32) {
    %c0_i32 = arith.constant 0 : i32
    %c0_i32_0 = arith.constant 0 : i32
    %c0_i32_1 = arith.constant 0 : i32
    return %c0_i32, %c0_i32_0 : i32, i32
  }
  func.func @transform_5(%arg0: i32) -> (i32, i32) {
    %c0_i32 = arith.constant 0 : i32
    %c0_i32_0 = arith.constant 0 : i32
    %c0_i32_1 = arith.constant 0 : i32
    return %c0_i32, %c0_i32_0 : i32, i32
  }
  func.func @transform_6(%arg0: i32) -> (i32, i32) {
    %c0_i32 = arith.constant 0 : i32
    %c0_i32_0 = arith.constant 0 : i32
    %c0_i32_1 = arith.constant 0 : i32
    return %c0_i32, %c0_i32_0 : i32, i32
  }
  func.func @transform_7(%arg0: i32) -> (i32, i32) {
    %c0_i32 = arith.constant 0 : i32
    %c0_i32_0 = arith.constant 0 : i32
    %c0_i32_1 = arith.constant 0 : i32
    return %c0_i32, %c0_i32_0 : i32, i32
  }
  func.func @transform_8(%arg0: i32) -> (i32, i32) {
    %c0_i32 = arith.constant 0 : i32
    %c0_i32_0 = arith.constant 0 : i32
    %c0_i32_1 = arith.constant 0 : i32
    return %c0_i32, %c0_i32_0 : i32, i32
  }
  func.func @transform_9(%arg0: i32) -> (i32, i32) {
    %c0_i32 = arith.constant 0 : i32
    %c0_i32_0 = arith.constant 0 : i32
    return %arg0, %c0_i32 : i32, i32
  }
}

</mosaic_0001>

<bundles_post_ra>
// kernel: tpu_custom_call.1
= control target key start
LH: loop header
LB: loop body
LE: loop exit
PB: predicated region body
PF: predicated region fallthrough
CT: control target
= control target key end

     0   :  { %s5876_s0 = inlined_call_operand.hbm [shape: s32[2,8], index: 0, kind: input, shape index: {}]   ;;  %s5877_s1 = inlined_call_operand.hbm [shape: s32[2,8], index: 1, kind: input, shape index: {}]   ;;  %s5878_s2 = inlined_call_operand.hbm [shape: f32[2,8], index: 2, kind: input, shape index: {}]   ;;  %s5879_s3 = inlined_call_operand.hbm [shape: f32[2,8], index: 3, kind: input, shape index: {}]   ;;  %s5880_s4 = inlined_call_operand.hbm [shape: bf16[128,384], index: 4, kind: input, shape index: {}]   ;;  %s5881_s5 = inlined_call_operand.hbm [shape: bf16[1152,768], index: 5, kind: input, shape index: {}]   ;;  %s5882_s6 = inlined_call_operand.hbm [shape: f32[1,768], index: 6, kind: input, shape index: {}]   ;;  %s5883_s7 = inlined_call_operand.hbm [shape: f32[1,768], index: 7, kind: input, shape index: {}]   ;;  %s5884_s8 = inlined_call_operand.<no memory space> [shape: f32[1,1], index: 8, kind: input, shape index: {}]   ;;  %s5885_s9 = inlined_call_operand.vmem [shape: f32[2,1], index: 9, kind: output, shape index: {}]  }
   0x1   :  { %v14_v0 = vstv %s5884_s8 }
   0x2   :  { %15 = vst [vmem:[#allocation2] sm:$0x1] %v14_v0 }
   0x3   :  { %16 = vsyncpa [#allocation4], 0 }
   0x4   :  { %17 = vsyncpa [#allocation6], 0 }
   0x5   :  { %18 = vsyncpa [#allocation9], 0 }
   0x6   :  { %19 = vsyncpa [#allocation12], 0 }
   0x7   :  { %20 = vsyncpa [#allocation15], 0  ;;  %s5471_s11 = smov [#allocation5]   ;;  %s5472_s13 = smov [#allocation8]  }
   0x8   :  { %s37_s12 = sshll.u32 %s5471_s11, 4  ;;  %s57_s14 = sshll.u32 %s5472_s13, 4  ;;  %s38_s12 = int_to_ptr.vmem [resolvable:$true] %s37_s12  ;;  %s58_s14 = int_to_ptr.vmem [resolvable:$true] %s57_s14 }
   0x9   :  { %s5285_s17 = scalar_lea.hbm %s5877_s1, 32 }
   0xa   :  { %p5286_p0 = scmp.ne.s32.totalorder %s5877_s1, %s5285_s17  ;;  %p5289_p1 = scmp.lt.u32.totalorder %s5285_s17, %s5877_s1 }
   0xc   :  { %p5291_p2 = pnand %p5289_p1, %p5286_p0 }
   0xe   :  { %5294 = shalt.err (!%p5291_p2)
}
   0xf   :  { %s5295_s21 = scalar_lea.vmem %s38_s12, 32  ;;  %p5300_p4 = scmp.lt.s32.totalorder %s38_s12, %s38_s12 }
  0x10   :  { %p5296_p3 = scmp.ne.s32.totalorder %s38_s12, %s5295_s21  ;;  %p5301_p5 = scmp.lt.s32.totalorder %s5295_s21, %s5295_s21 }
  0x12   :  { %p5302_p6 = por %p5301_p5, %p5300_p4 }
  0x14   :  { %p5303_p7 = pnand %p5302_p6, %p5296_p3 }
  0x16   :  { %5306 = shalt.err (!%p5303_p7)
}
  0x17   :  { %40 = dma.hbm_to_vmem [thread:$0]  %s5877_s1, 32, %s38_s12, [#allocation6]  }
  0x18   :  { %s5307_s26 = scalar_lea.hbm %s5879_s3, 32 }
  0x19   :  { %p5308_p8 = scmp.ne.s32.totalorder %s5879_s3, %s5307_s26  ;;  %p5311_p9 = scmp.lt.u32.totalorder %s5307_s26, %s5879_s3 }
  0x1b   :  { %p5313_p10 = pnand %p5311_p9, %p5308_p8 }
  0x1d   :  { %5316 = shalt.err (!%p5313_p10)
}
  0x1e   :  { %s5317_s10 = scalar_lea.vmem %s58_s14, 32  ;;  %p5322_p12 = scmp.lt.s32.totalorder %s58_s14, %s58_s14 }
  0x1f   :  { %p5318_p11 = scmp.ne.s32.totalorder %s58_s14, %s5317_s10  ;;  %p5323_p13 = scmp.lt.s32.totalorder %s5317_s10, %s5317_s10 }
  0x21   :  { %p5324_p0 = por %p5323_p13, %p5322_p12 }
  0x23   :  { %p5325_p1 = pnand %p5324_p0, %p5318_p11 }
  0x25   :  { %5328 = shalt.err (!%p5325_p1)
}
  0x26   :  { %60 = dma.hbm_to_vmem [thread:$0]  %s5879_s3, 32, %s58_s14, [#allocation9]  }
  0x27   :  { %s5473_s12 = smov [#allocation11]   ;;  %s5329_s17 = scalar_lea.hbm %s5881_s5, 55296 }
  0x28   :  { %s78_s13 = sshll.u32 %s5473_s12, 4  ;;  %p5330_p2 = scmp.ne.s32.totalorder %s5881_s5, %s5329_s17  ;;  %s79_s13 = int_to_ptr.vmem [resolvable:$true] %s78_s13 }
  0x29   :  { %p5333_p3 = scmp.lt.u32.totalorder %s5329_s17, %s5881_s5 }
  0x2b   :  { %p5335_p4 = pnand %p5333_p3, %p5330_p2 }
  0x2d   :  { %5338 = shalt.err (!%p5335_p4)
}
  0x2e   :  { %s5339_s21 = scalar_lea.vmem %s79_s13, 55296  ;;  %p5344_p6 = scmp.lt.s32.totalorder %s79_s13, %s79_s13 }
  0x2f   :  { %p5340_p5 = scmp.ne.s32.totalorder %s79_s13, %s5339_s21  ;;  %p5345_p7 = scmp.lt.s32.totalorder %s5339_s21, %s5339_s21 }
  0x31   :  { %p5346_p8 = por %p5345_p7, %p5344_p6 }
  0x33   :  { %p5347_p9 = pnand %p5346_p8, %p5340_p5 }
  0x35   :  { %5350 = shalt.err (!%p5347_p9)
}
  0x36   :  { %s5474_s3 = smov 384   ;;  %s5475_s14 = smov 24  }
  0x37   :  { %84 = dma.hbm_to_vmem [thread:$0]  %s5881_s5, 55296, %s79_s13, [#allocation12], %s5474_s3, %s5474_s3, %s5475_s14  }
  0x38   :  { %s5476_s24 = smov [#allocation3]   ;;  %s5477_s26 = smov [#allocation7]  }
  0x39   :  { %s27_s25 = sshll.u32 %s5476_s24, 4  ;;  %s47_s27 = sshll.u32 %s5477_s26, 4  ;;  %s28_s25 = int_to_ptr.vmem [resolvable:$true] %s27_s25  ;;  %s48_s27 = int_to_ptr.vmem [resolvable:$true] %s47_s27 }
  0x3a   :  { %s5351_s30 = scalar_lea.hbm %s5876_s0, 32 }
  0x3b   :  { %p5352_p10 = scmp.ne.s32.totalorder %s5876_s0, %s5351_s30  ;;  %p5355_p11 = scmp.lt.u32.totalorder %s5351_s30, %s5876_s0 }
  0x3d   :  { %p5357_p12 = pnand %p5355_p11, %p5352_p10 }
  0x3f   :  { %5360 = shalt.err (!%p5357_p12)
}
  0x40   :  { %s5361_s5 = scalar_lea.vmem %s28_s25, 32  ;;  %p5366_p0 = scmp.lt.s32.totalorder %s28_s25, %s28_s25 }
  0x41   :  { %p5362_p13 = scmp.ne.s32.totalorder %s28_s25, %s5361_s5  ;;  %p5367_p1 = scmp.lt.s32.totalorder %s5361_s5, %s5361_s5 }
  0x43   :  { %p5368_p2 = por %p5367_p1, %p5366_p0 }
  0x45   :  { %p5369_p3 = pnand %p5368_p2, %p5362_p13 }
  0x47   :  { %5372 = shalt.err (!%p5369_p3)
}
  0x48   :  { %30 = dma.hbm_to_vmem [thread:$0]  %s5876_s0, 32, %s28_s25, [#allocation4]  }
  0x49   :  { %s5373_s18 = scalar_lea.hbm %s5878_s2, 32 }
  0x4a   :  { %p5374_p4 = scmp.ne.s32.totalorder %s5878_s2, %s5373_s18  ;;  %p5377_p5 = scmp.lt.u32.totalorder %s5373_s18, %s5878_s2 }
  0x4c   :  { %p5379_p6 = pnand %p5377_p5, %p5374_p4 }
  0x4e   :  { %5382 = shalt.err (!%p5379_p6)
}
  0x4f   :  { %s5383_s3 = scalar_lea.vmem %s48_s27, 32  ;;  %p5388_p8 = scmp.lt.s32.totalorder %s48_s27, %s48_s27 }
  0x50   :  { %p5384_p7 = scmp.ne.s32.totalorder %s48_s27, %s5383_s3  ;;  %p5389_p9 = scmp.lt.s32.totalorder %s5383_s3, %s5383_s3 }
  0x52   :  { %p5390_p10 = por %p5389_p9, %p5388_p8 }
  0x54   :  { %p5391_p11 = pnand %p5390_p10, %p5384_p7 }
  0x56   :  { %5394 = shalt.err (!%p5391_p11)
}
  0x57   :  { %50 = dma.hbm_to_vmem [thread:$0]  %s5878_s2, 32, %s48_s27, [#allocation6]  }
  0x58   :  { %s5478_s22 = smov [#allocation10]   ;;  %s5395_s26 = scalar_lea.hbm %s5880_s4, 3072 }
  0x59   :  { %s66_s23 = sshll.u32 %s5478_s22, 4  ;;  %p5396_p12 = scmp.ne.s32.totalorder %s5880_s4, %s5395_s26  ;;  %s67_s23 = int_to_ptr.vmem [resolvable:$true] %s66_s23 }
  0x5a   :  { %p5399_p13 = scmp.lt.u32.totalorder %s5395_s26, %s5880_s4 }
  0x5c   :  { %p5401_p0 = pnand %p5399_p13, %p5396_p12 }
  0x5e   :  { %5404 = shalt.err (!%p5401_p0)
}
  0x5f   :  { %s5405_s1 = scalar_lea.vmem %s67_s23, 3072  ;;  %p5410_p2 = scmp.lt.s32.totalorder %s67_s23, %s67_s23 }
  0x60   :  { %p5406_p1 = scmp.ne.s32.totalorder %s67_s23, %s5405_s1  ;;  %p5411_p3 = scmp.lt.s32.totalorder %s5405_s1, %s5405_s1 }
  0x62   :  { %p5412_p4 = por %p5411_p3, %p5410_p2 }
  0x64   :  { %p5413_p5 = pnand %p5412_p4, %p5406_p1 }
  0x66   :  { %5416 = shalt.err (!%p5413_p5)
}
  0x67   :  { %s5479_s2 = smov 192   ;;  %s5480_s27 = smov 12  }
  0x68   :  { %72 = dma.hbm_to_vmem [thread:$0]  %s5880_s4, 3072, %s67_s23, [#allocation9], %s5479_s2, %s5479_s2, %s5480_s27  }
  0x69   :  { %s5481_s5 = smov [#allocation13]   ;;  %s5482_s15 = smov [#allocation14]  }
  0x6a   :  { %s91_s13 = sshll.u32 %s5481_s5, 4  ;;  %s101_s16 = sshll.u32 %s5482_s15, 4  ;;  %s92_s13 = int_to_ptr.vmem [resolvable:$true] %s91_s13  ;;  %s102_s16 = int_to_ptr.vmem [resolvable:$true] %s101_s16 }
  0x6b   :  { %s5417_s19 = scalar_lea.hbm %s5882_s6, 96 }
  0x6c   :  { %p5418_p6 = scmp.ne.s32.totalorder %s5882_s6, %s5417_s19  ;;  %p5421_p7 = scmp.lt.u32.totalorder %s5417_s19, %s5882_s6 }
  0x6e   :  { %p5423_p8 = pnand %p5421_p7, %p5418_p6 }
  0x70   :  { %5426 = shalt.err (!%p5423_p8)
}
  0x71   :  { %s5427_s4 = scalar_lea.vmem %s92_s13, 96  ;;  %p5432_p10 = scmp.lt.s32.totalorder %s92_s13, %s92_s13 }
  0x72   :  { %p5428_p9 = scmp.ne.s32.totalorder %s92_s13, %s5427_s4  ;;  %p5433_p11 = scmp.lt.s32.totalorder %s5427_s4, %s5427_s4 }
  0x74   :  { %p5434_p12 = por %p5433_p11, %p5432_p10 }
  0x76   :  { %p5435_p13 = pnand %p5434_p12, %p5428_p9 }
  0x78   :  { %5438 = shalt.err (!%p5435_p13)
}
  0x79   :  { %94 = dma.hbm_to_vmem [thread:$0]  %s5882_s6, 96, %s92_s13, [#allocation12]  }
  0x7a   :  { %s5439_s24 = scalar_lea.hbm %s5883_s7, 96 }
  0x7b   :  { %p5440_p0 = scmp.ne.s32.totalorder %s5883_s7, %s5439_s24  ;;  %p5443_p1 = scmp.lt.u32.totalorder %s5439_s24, %s5883_s7 }
  0x7d   :  { %p5445_p2 = pnand %p5443_p1, %p5440_p0 }
  0x7f   :  { %5448 = shalt.err (!%p5445_p2)
}
  0x80   :  { %s5449_s30 = scalar_lea.vmem %s102_s16, 96  ;;  %p5454_p4 = scmp.lt.s32.totalorder %s102_s16, %s102_s16 }
  0x81   :  { %p5450_p3 = scmp.ne.s32.totalorder %s102_s16, %s5449_s30  ;;  %p5455_p5 = scmp.lt.s32.totalorder %s5449_s30, %s5449_s30 }
  0x83   :  { %p5456_p6 = por %p5455_p5, %p5454_p4 }
  0x85   :  { %p5457_p7 = pnand %p5456_p6, %p5450_p3 }
  0x87   :  { %5460 = shalt.err (!%p5457_p7)
}
  0x88   :  { %104 = dma.hbm_to_vmem [thread:$0]  %s5883_s7, 96, %s102_s16, [#allocation15]  }
  0x89   :  { %5461 = dma.done.wait [#allocation4], 32  }
  0x8a   :  { %5462 = vsyncadd [#allocation4], 4294967264 }
  0x8b   :  { %5463 = dma.done.wait [#allocation6], 64  }
  0x8c   :  { %5464 = vsyncadd [#allocation6], 4294967232 }
  0x8d   :  { %5465 = dma.done.wait [#allocation9], 3104  }
  0x8e   :  { %5466 = vsyncadd [#allocation9], 4294964192 }
  0x8f   :  { %5467 = dma.done.wait [#allocation12], 55392  }
  0x90   :  { %5468 = vsyncadd [#allocation12], 4294911904 }
  0x91   :  { %5469 = dma.done.wait [#allocation15], 96  }
  0x92   :  { %5470 = vsyncadd [#allocation15], 4294967200  ;;  %v166_v1 = vlaneseq  ;;  %v5483_v2 = vmov 0.0   ;;  %v164_v6 = vld [vmem:[#allocation3] sm:$0x3]  ;;  %v5484_v31 = vmov 0  }
  0x93   :  { %4529 = vmatprep.subr.bf16.mxu1 %v5483_v2  ;;  %v5645_v7 = vld [vmem:[#allocation7] sm:$0x3]  ;;  %v440_v10 = vld [vmem:[#allocation5] sm:$0x3]  ;;  %v5650_v11 = vld [vmem:[#allocation10 + $0x4] ss:$12 sps:$4 sm:$0xff]   ;;  %382 = vmatprep.mubr.bf16.mxu0 %v5484_v31 }
  0x94   :  { %v5637_v3 = vshrl.u32 %v166_v1, 7  ;;  %v5652_v12 = vld [vmem:[#allocation10] ss:$12 sps:$4 sm:$0xff]   ;;  %v5657_v15 = vld [vmem:[#allocation10 + $0x8] ss:$12 sps:$4 sm:$0xff]   ;;  %350 = vmatprep.subr.bf16.mxu0 %v5650_v11  ;;  %vm5485_vm0 = vmmov 0  }
  0x95   :  { %v5660_v16 = vld [vmem:[#allocation10 + $0x1c] ss:$12 sps:$4 sm:$0xff]   ;;  %351 = vmatpush1.bf16.msra.mxu0 %v5652_v12  ;;  %4530 = vmatpush3.bf16.msra.mxu1 %v5657_v15  ;;  %v4590_v17 = vld [vmem:[#allocation10 + $0x18] ss:$12 sps:$4 sm:$0xff]   ;;  %v5666_v18 = vld [vmem:[#allocation10 + $0x20] ss:$12 sps:$4 sm:$0xff]  }
  0x96   :  { %v5640_v4 = vsub.s32 0, %v5637_v3  ;;  %v5643_v5 = vsub.s32 1, %v5637_v3  ;;  %352 = vmatprep.subr.bf16.mxu0 %v5660_v16  ;;  %4531 = vmatprep.subr.bf16.mxu1 %v5483_v2  ;;  %v441_v21 = vld [vmem:[#allocation8] sm:$0x3]  ;;  %v5670_v22 = vld [vmem:[#allocation10 + $0x34] ss:$12 sps:$4 sm:$0xff]  }
  0x97   :  { %v4594_v23 = vld [vmem:[#allocation10 + $0x30] ss:$12 sps:$4 sm:$0xff]   ;;  %v4595_v24 = vld [vmem:[#allocation10 + $0x38] ss:$12 sps:$4 sm:$0xff]   ;;  %v4598_v28 = vld [vmem:[#allocation10 + $0x48] ss:$12 sps:$4 sm:$0xff]   ;;  %4545 = vmatprep.mubr.msk.bf16.mxu1 %vm5485_vm0, %v5483_v2 }
  0x98   :  { %v171_v8 = vrot.slane %v164_v6, %v5640_v4  ;;  %v187_v9 = vrot.slane %v5645_v7, %v5640_v4  ;;  %v178_v13 = vrot.slane %v164_v6, %v5643_v5  ;;  %v194_v14 = vrot.slane %v5645_v7, %v5643_v5  ;;  %v5675_v25 = vld [vmem:[#allocation10 + $0x4c] ss:$12 sps:$4 sm:$0xff]   ;;  %v4599_v29 = vld [vmem:[#allocation10 + $0x50] ss:$12 sps:$4 sm:$0xff]   ;;  %v5688_v33 = vld [vmem:[#allocation10 + $0x68] ss:$12 sps:$4 sm:$0xff]  }
  0x99   :  { %v452_v19 = vrot.slane %v440_v10, %v5643_v5  ;;  %v445_v20 = vrot.slane %v440_v10, %v5640_v4  ;;  %353 = vmatpush1.bf16.msra.mxu0 %v4590_v17  ;;  %4532 = vmatpush3.bf16.msra.mxu1 %v5666_v18  ;;  %v468_v26 = vrot.slane %v441_v21, %v5643_v5  ;;  %v5681_v30 = vld [vmem:[#allocation10 + $0x64] ss:$12 sps:$4 sm:$0xff]   ;;  %v5686_v32 = vld [vmem:[#allocation10 + $0x60] ss:$12 sps:$4 sm:$0xff]   ;;  %v5692_v34 = vld [vmem:[#allocation10 + $0x7c] ss:$12 sps:$4 sm:$0xff]  }
  0x9a   :  { %173 = vbcast.lane.b32.xlu0 %v171_v8, 256  ;;  %189 = vbcast.lane.b32.xlu1 %v187_v9, 256  ;;  %v461_v27 = vrot.slane %v441_v21, %v5640_v4  ;;  %v4606_v35 = vld [vmem:[#allocation10 + $0x78] ss:$12 sps:$4 sm:$0xff]   ;;  %v4607_v36 = vld [vmem:[#allocation10 + $0x80] ss:$12 sps:$4 sm:$0xff]  }
  0x9b   :  { %354 = vmatprep.subr.bf16.mxu0 %v5670_v22  ;;  %4533 = vmatprep.subr.bf16.mxu1 %v5483_v2  ;;  %v4608_v37 = vld [vmem:[#allocation10 + $0x94] ss:$12 sps:$4 sm:$0xff]   ;;  %v4610_v38 = vld [vmem:[#allocation10 + $0x90] ss:$12 sps:$4 sm:$0xff]   ;;  %v4611_v39 = vld [vmem:[#allocation10 + $0x98] ss:$12 sps:$4 sm:$0xff]  }
  0x9c   :  { %v4612_v40 = vld [vmem:[#allocation10 + $0xac] ss:$12 sps:$4 sm:$0xff]   ;;  %v4614_v41 = vld [vmem:[#allocation10 + $0xa8] ss:$12 sps:$4 sm:$0xff]   ;;  %v4615_v42 = vld [vmem:[#allocation10 + $0xb0] ss:$12 sps:$4 sm:$0xff]  }
  0x9d   :  { %355 = vmatpush1.bf16.msra.mxu0 %v4594_v23  ;;  %4534 = vmatpush3.bf16.msra.mxu1 %v4595_v24  ;;  %vm431_vm1 = vcmask 58368   ;;  %v167_v45 = vand.u32 127, %v166_v1  ;;  %vm218_vm6 = vcmask 1041409   ;;  %vm4014_vm7 = vcmask 1041408  }
  0x9e   :  { %180 = vbcast.lane.b32.xlu0 %v178_v13, 256  ;;  %196 = vbcast.lane.b32.xlu1 %v194_v14, 256  ;;  %v432_v43 = vsel %vm431_vm1, %v5645_v7, 0.0  ;;  %v576_v44 = vsel %vm431_vm1, %v441_v21, 0.0  ;;  %vm4042_vm8 = vcmask 1024  }
  0x9f   :  { %356 = vmatprep.subr.bf16.mxu0 %v5675_v25  ;;  %4535 = vmatprep.subr.bf16.mxu1 %v5483_v2 }
  0xa1   :  { %357 = vmatpush1.bf16.msra.mxu0 %v4598_v28  ;;  %4536 = vmatpush3.bf16.msra.mxu1 %v4599_v29  ;;  %v5272_v28 = vld [vmem:[#allocation10 + $0x18] ss:$12 sps:$4 sm:$0xff]  }
  0xa2   :  { %454 = vbcast.lane.b32.xlu1 %v452_v19, 256  ;;  %447 = vbcast.lane.b32.xlu0 %v445_v20, 256  ;;  %v5274_v29 = vld [vmem:[#allocation10 + $0x38] ss:$12 sps:$4 sm:$0xff]  }
  0xa3   :  { %358 = vmatprep.subr.bf16.mxu0 %v5681_v30  ;;  %4537 = vmatprep.subr.bf16.mxu1 %v5483_v2 }
  0xa5   :  { %359 = vmatpush1.bf16.msra.mxu0 %v5686_v32  ;;  %4538 = vmatpush3.bf16.msra.mxu1 %v5688_v33 }
  0xa6   :  { %470 = vbcast.lane.b32.xlu1 %v468_v26, 256  ;;  %463 = vbcast.lane.b32.xlu0 %v461_v27, 256 }
  0xa7   :  { %360 = vmatprep.subr.bf16.mxu0 %v5692_v34  ;;  %4539 = vmatprep.subr.bf16.mxu1 %v5483_v2 }
  0xa9   :  { %361 = vmatpush1.bf16.msra.mxu0 %v4606_v35  ;;  %4540 = vmatpush3.bf16.msra.mxu1 %v4607_v36 }
  0xaa   :  { %362 = vmatprep.subr.bf16.mxu0 %v4608_v37  ;;  %4541 = vmatprep.subr.bf16.mxu1 %v5483_v2  ;;  %v5275_v37 = vld [vmem:[#allocation10 + $0x48] ss:$12 sps:$4 sm:$0xff]  }
  0xad   :  { %363 = vmatpush1.bf16.msra.mxu0 %v4610_v38  ;;  %4542 = vmatpush3.bf16.msra.mxu1 %v4611_v39  ;;  %v5276_v38 = vld [vmem:[#allocation10 + $0x50] ss:$12 sps:$4 sm:$0xff]  }
  0xae   :  { %364 = vmatprep.subr.bf16.mxu0 %v4612_v40  ;;  %4543 = vmatprep.subr.bf16.mxu1 %v5483_v2  ;;  %v5277_v40 = vld [vmem:[#allocation10 + $0x78] ss:$12 sps:$4 sm:$0xff]  }
  0xb1   :  { %365 = vmatpush1.bf16.msra.mxu0 %v4614_v41  ;;  %4544 = vmatpush3.bf16.msra.mxu1 %v4615_v42  ;;  %v5278_v41 = vld [vmem:[#allocation10 + $0x80] ss:$12 sps:$4 sm:$0xff]  }
  0xb2   :  { %495 = vmatprep.subr.bf16.mxu0 %v5650_v11  ;;  %4549 = vmatprep.subr.bf16.mxu1 %v5483_v2  ;;  %v5279_v42 = vld [vmem:[#allocation10 + $0x94] ss:$12 sps:$4 sm:$0xff]  }
  0xc5   :  { %577 = vadd.xlane.f32.xlu0 %v576_v44  ;;  %v4618_v44 = vld [vmem:[#allocation11 + $0x484] ss:$24 sps:$4 sm:$0xff]  }
  0xca   :  { %433 = vadd.xlane.f32.xlu1 %v432_v43 }
 0x10c   :  { %v174_v46 = vpop.permute.xlu0 %173  ;;  %v190_v47 = vpop.permute.xlu1 %189 }
 0x10d   :  { %vm182_vm2 = vcmp.eq.s32.totalorder %v174_v46, %v167_v45  ;;  %v5283_v46 = vld [vmem:[#allocation10 + $0xa8] ss:$12 sps:$4 sm:$0xff]  }
 0x10e   :  { %v198_v48 = vsel %vm182_vm2, %v190_v47, 0.0  ;;  %v5284_v47 = vld [vmem:[#allocation10 + $0xb0] ss:$12 sps:$4 sm:$0xff]  }
 0x10f   :  { %v200_v49 = vrot.slane %v198_v48, 4 }
 0x110   :  { %v181_v50 = vpop.permute.xlu0 %180  ;;  %v197_v51 = vpop.permute.xlu1 %196 }
 0x111   :  { %v201_v52 = vadd.f32 %v200_v49, %v198_v48  ;;  %vm183_vm3 = vcmp.eq.s32.totalorder %v181_v50, %v167_v45  ;;  %v4616_v48 = vld [vmem:[#allocation11 + $0x480] ss:$24 sps:$4 sm:$0xff]   ;;  %v4621_v50 = vld [vmem:[#allocation11 + $0x4b4] ss:$24 sps:$4 sm:$0xff]  }
 0x112   :  { %v199_v53 = vsel %vm183_vm3, %v197_v51, 0.0  ;;  %v4619_v51 = vld [vmem:[#allocation11 + $0x4b0] ss:$24 sps:$4 sm:$0xff]  }
 0x113   :  { %v202_v54 = vrot.slane %v201_v52, 2  ;;  %v206_v55 = vrot.slane %v199_v53, 4 }
 0x114   :  { %v455_v58 = vpop.permute.xlu1 %454  ;;  %v448_v59 = vpop.permute.xlu0 %447 }
 0x115   :  { %v203_v56 = vadd.f32 %v202_v54, %v201_v52  ;;  %v207_v57 = vadd.f32 %v206_v55, %v199_v53  ;;  %vm457_vm4 = vcmp.eq.s32.totalorder %v455_v58, %v167_v45  ;;  %vm456_vm5 = vcmp.eq.s32.totalorder %v448_v59, %v167_v45  ;;  %v4624_v52 = vld [vmem:[#allocation11 + $0x4e4] ss:$24 sps:$4 sm:$0xff]   ;;  %v4627_v53 = vld [vmem:[#allocation11 + $0x514] ss:$24 sps:$4 sm:$0xff]   ;;  %v4625_v54 = vld [vmem:[#allocation11 + $0x510] ss:$24 sps:$4 sm:$0xff]  }
 0x116   :  { %v4630_v55 = vld [vmem:[#allocation11 + $0x544] ss:$24 sps:$4 sm:$0xff]   ;;  %v4631_v58 = vld [vmem:[#allocation11 + $0x570] ss:$24 sps:$4 sm:$0xff]  }
 0x117   :  { %v204_v60 = vrot.slane %v203_v56, 1  ;;  %v208_v61 = vrot.slane %v207_v57, 2  ;;  %v4636_v59 = vld [vmem:[#allocation11 + $0x5a4] ss:$24 sps:$4 sm:$0xff]  }
 0x118   :  { %v471_v1 = vpop.permute.xlu1 %470  ;;  %v464_v6 = vpop.permute.xlu0 %463 }
 0x119   :  { %v205_v62 = vadd.f32 %v204_v60, %v203_v56  ;;  %v209_v63 = vadd.f32 %v208_v61, %v207_v57  ;;  %v473_v9 = vsel %vm457_vm4, %v471_v1, 0.0  ;;  %v472_v10 = vsel %vm456_vm5, %v464_v6, 0.0  ;;  %v4628_v56 = vld [vmem:[#allocation11 + $0x540] ss:$24 sps:$4 sm:$0xff]   ;;  %v4633_v57 = vld [vmem:[#allocation11 + $0x574] ss:$24 sps:$4 sm:$0xff]  }
 0x11a   :  { %v480_v17 = vrot.slane %v473_v9, 4  ;;  %v474_v19 = vrot.slane %v472_v10, 4  ;;  %v4634_v60 = vld [vmem:[#allocation11 + $0x5a0] ss:$24 sps:$4 sm:$0xff]   ;;  %v4639_v61 = vld [vmem:[#allocation11 + $0x5d4] ss:$24 sps:$4 sm:$0xff]  }
 0x11b   :  { %v210_v0 = vrot.slane %v209_v63, 1  ;;  %v212_v7 = vpack.c.bf16 %v205_v62, %v205_v62  ;;  %v4637_v62 = vld [vmem:[#allocation11 + $0x5d0] ss:$24 sps:$4 sm:$0xff]   ;;  %v4643_v1 = vld [vmem:[#allocation11 + $0x600] ss:$24 sps:$4 sm:$0xff]  }
 0x11c   :  { %v481_v23 = vadd.f32 %v480_v17, %v473_v9  ;;  %v475_v24 = vadd.f32 %v474_v19, %v472_v10  ;;  %v4645_v6 = vld [vmem:[#allocation11 + $0x604] ss:$24 sps:$4 sm:$0xff]   ;;  %v4651_v9 = vld [vmem:[#allocation11 + $0x634] ss:$24 sps:$4 sm:$0xff]   ;;  %v4655_v19 = vld [vmem:[#allocation11 + $0x660] ss:$24 sps:$4 sm:$0xff]  }
 0x11d   :  { %v211_v8 = vadd.f32 %v210_v0, %v209_v63  ;;  %v216_v13 = vunpack.c.l.b16 %v212_v7  ;;  %v4642_v63 = vld [vmem:[#allocation11 + $0x784] ss:$24 sps:$4 sm:$0xff]   ;;  %v4640_v0 = vld [vmem:[#allocation11 + $0x780] ss:$24 sps:$4 sm:$0xff]   ;;  %v4646_v7 = vld [vmem:[#allocation11 + $0x7b0] ss:$24 sps:$4 sm:$0xff]  }
 0x11e   :  { %v482_v26 = vrot.slane %v481_v23, 2  ;;  %v476_v27 = vrot.slane %v475_v24, 2  ;;  %v4654_v10 = vld [vmem:[#allocation11 + $0x7e4] ss:$24 sps:$4 sm:$0xff]   ;;  %v4660_v17 = vld [vmem:[#allocation11 + $0x814] ss:$24 sps:$4 sm:$0xff]  }
 0x11f   :  { %v213_v11 = vpack.c.bf16 %v211_v8, %v211_v8  ;;  %v4648_v8 = vld [vmem:[#allocation11 + $0x7b4] ss:$24 sps:$4 sm:$0xff]  }
 0x121   :  { %v217_v14 = vunpack.c.l.b16 %v213_v11  ;;  %v4649_v11 = vld [vmem:[#allocation11 + $0x630] ss:$24 sps:$4 sm:$0xff]  }
 0x123   :  { %v219_v20 = vsel %vm218_vm6, %v217_v14, %v216_v13  ;;  %v4657_v13 = vld [vmem:[#allocation11 + $0x664] ss:$24 sps:$4 sm:$0xff]   ;;  %v4652_v14 = vld [vmem:[#allocation11 + $0x7e0] ss:$24 sps:$4 sm:$0xff]  }
 0x124   :  { %v220_v21 = vpack.c.b16 %v219_v20, %v219_v20  ;;  %v4663_v20 = vld [vmem:[#allocation11 + $0x694] ss:$24 sps:$4 sm:$0xff]  }
 0x126   :  { %383 = vmatmul.mubr.bf16.vlgmr.msra.gmra.mrb[0].mxu0 %v220_v21  ;;  %4546 = vmatmul.mubr.bf16.vlgmr.msra.gmra.mrb[0].mxu1 %v220_v21  ;;  %v4658_v21 = vld [vmem:[#allocation11 + $0x810] ss:$24 sps:$4 sm:$0xff]  }
 0x127   :  { %496 = vmatpush1.bf16.msra.mxu0 %v5652_v12  ;;  %4550 = vmatpush3.bf16.msra.mxu1 %v5657_v15  ;;  %v483_v12 = vadd.f32 %v482_v26, %v481_v23  ;;  %v477_v15 = vadd.f32 %v476_v27, %v475_v24  ;;  %v4666_v23 = vld [vmem:[#allocation11 + $0x844] ss:$24 sps:$4 sm:$0xff]   ;;  %v4661_v24 = vld [vmem:[#allocation11 + $0x690] ss:$24 sps:$4 sm:$0xff]   ;;  %v4664_v27 = vld [vmem:[#allocation11 + $0x840] ss:$24 sps:$4 sm:$0xff]  }
 0x128   :  { %497 = vmatprep.subr.bf16.mxu0 %v5660_v16  ;;  %4551 = vmatprep.subr.bf16.mxu1 %v5483_v2  ;;  %v5273_v16 = vld [vmem:[#allocation10 + $0x30] ss:$12 sps:$4 sm:$0xff]  }
 0x129   :  { %527 = vmatprep.mubr.bf16.mxu0 %v5484_v31  ;;  %4565 = vmatprep.mubr.msk.bf16.mxu1 %vm5485_vm0, %v5483_v2  ;;  %v484_v35 = vrot.slane %v483_v12, 1  ;;  %v478_v36 = vrot.slane %v477_v15, 1  ;;  %v4669_v26 = vld [vmem:[#allocation11 + $0x6c4] ss:$24 sps:$4 sm:$0xff]  }
 0x12b   :  { %498 = vmatpush1.bf16.msra.mxu0 %v5272_v28  ;;  %4552 = vmatpush3.bf16.msra.mxu1 %v5666_v18  ;;  %v485_v18 = vadd.f32 %v484_v35, %v483_v12  ;;  %v4672_v28 = vld [vmem:[#allocation11 + $0x874] ss:$24 sps:$4 sm:$0xff]   ;;  %v4667_v12 = vld [vmem:[#allocation11 + $0x6c0] ss:$24 sps:$4 sm:$0xff]   ;;  %v4673_v35 = vld [vmem:[#allocation11 + $0x6f0] ss:$24 sps:$4 sm:$0xff]  }
 0x12c   :  { %499 = vmatprep.subr.bf16.mxu0 %v5670_v22  ;;  %4553 = vmatprep.subr.bf16.mxu1 %v5483_v2  ;;  %v479_v22 = vadd.f32 %v478_v36, %v477_v15  ;;  %v4675_v15 = vld [vmem:[#allocation11 + $0x6f4] ss:$24 sps:$4 sm:$0xff]   ;;  %v4681_v36 = vld [vmem:[#allocation11 + $0x724] ss:$24 sps:$4 sm:$0xff]  }
 0x12e   :  { %v486_v39 = vpack.c.bf16 %v479_v22, %v479_v22  ;;  %v4682_v22 = vld [vmem:[#allocation11 + $0x8d0] ss:$24 sps:$4 sm:$0xff]  }
 0x12f   :  { %500 = vmatpush1.bf16.msra.mxu0 %v5273_v16  ;;  %4554 = vmatpush3.bf16.msra.mxu1 %v5274_v29  ;;  %v4670_v16 = vld [vmem:[#allocation11 + $0x870] ss:$24 sps:$4 sm:$0xff]   ;;  %v4678_v29 = vld [vmem:[#allocation11 + $0x8a4] ss:$24 sps:$4 sm:$0xff]  }
 0x130   :  { %501 = vmatprep.subr.bf16.mxu0 %v5675_v25  ;;  %4555 = vmatprep.subr.bf16.mxu1 %v5483_v2  ;;  %v487_v25 = vpack.c.bf16 %v485_v18, %v485_v18  ;;  %v490_v43 = vunpack.c.l.b16 %v486_v39  ;;  %v4684_v18 = vld [vmem:[#allocation11 + $0x8d4] ss:$24 sps:$4 sm:$0xff]   ;;  %v4685_v39 = vld [vmem:[#allocation11 + $0x750] ss:$24 sps:$4 sm:$0xff]  }
 0x133   :  { %502 = vmatpush1.bf16.msra.mxu0 %v5275_v37  ;;  %4556 = vmatpush3.bf16.msra.mxu1 %v5276_v38  ;;  %v4676_v37 = vld [vmem:[#allocation11 + $0x8a0] ss:$24 sps:$4 sm:$0xff]  }
 0x134   :  { %503 = vmatprep.subr.bf16.mxu0 %v5681_v30  ;;  %4557 = vmatprep.subr.bf16.mxu1 %v5483_v2  ;;  %v491_v30 = vunpack.c.l.b16 %v487_v25  ;;  %v4679_v38 = vld [vmem:[#allocation11 + $0x720] ss:$24 sps:$4 sm:$0xff]   ;;  %v4687_v25 = vld [vmem:[#allocation11 + $0x754] ss:$24 sps:$4 sm:$0xff]  }
 0x136   :  { %v492_v45 = vsel %vm218_vm6, %v491_v30, %v490_v43 }
 0x137   :  { %504 = vmatpush1.bf16.msra.mxu0 %v5686_v32  ;;  %4558 = vmatpush3.bf16.msra.mxu1 %v5688_v33  ;;  %v5280_v32 = vld [vmem:[#allocation10 + $0x90] ss:$12 sps:$4 sm:$0xff]   ;;  %v5281_v33 = vld [vmem:[#allocation10 + $0x98] ss:$12 sps:$4 sm:$0xff]   ;;  %v493_v49 = vpack.c.b16 %v492_v45, %v492_v45 }
 0x138   :  { %505 = vmatprep.subr.bf16.mxu0 %v5692_v34  ;;  %4559 = vmatprep.subr.bf16.mxu1 %v5483_v2  ;;  %v5282_v34 = vld [vmem:[#allocation10 + $0xac] ss:$12 sps:$4 sm:$0xff]  }
 0x13b   :  { %506 = vmatpush1.bf16.msra.mxu0 %v5277_v40  ;;  %4560 = vmatpush3.bf16.msra.mxu1 %v5278_v41  ;;  %v4690_v40 = vld [vmem:[#allocation11 + $0x48c] ss:$24 sps:$4 sm:$0xff]  }
 0x13c   :  { %507 = vmatprep.subr.bf16.mxu0 %v5279_v42  ;;  %4561 = vmatprep.subr.bf16.mxu1 %v5483_v2  ;;  %v4693_v41 = vld [vmem:[#allocation11 + $0x78c] ss:$24 sps:$4 sm:$0xff]  }
 0x13f   :  { %508 = vmatpush1.bf16.msra.mxu0 %v5280_v32  ;;  %4562 = vmatpush3.bf16.msra.mxu1 %v5281_v33 }
 0x140   :  { %509 = vmatprep.subr.bf16.mxu0 %v5282_v34  ;;  %4563 = vmatprep.subr.bf16.mxu1 %v5483_v2  ;;  %v4622_v2 = vld [vmem:[#allocation11 + $0x4e0] ss:$24 sps:$4 sm:$0xff]  }
 0x143   :  { %510 = vmatpush1.bf16.msra.mxu0 %v5283_v46  ;;  %4564 = vmatpush3.bf16.msra.mxu1 %v5284_v47 }
 0x144   :  { %1604 = vmatprep.subr.bf16.mxu0 %v4618_v44  ;;  %1645 = vmatprep.subr.bf16.mxu1 %v4642_v63  ;;  %v4688_v63 = vld [vmem:[#allocation11 + $0x488] ss:$24 sps:$4 sm:$0xff]  }
 0x146   :  { %528 = vmatmul.mubr.bf16.vlgmr.msra.gmra.mrb[4].mxu0 %v493_v49  ;;  %4566 = vmatmul.mubr.bf16.vlgmr.msra.gmra.mrb[4].mxu1 %v493_v49 }
 0x147   :  { %1605 = vmatpush1.bf16.msra.mxu0 %v4616_v48  ;;  %1677 = vmatprep.mubr.bf16.mxu1 %v5484_v31 }
 0x148   :  { %1606 = vmatprep.subr.bf16.mxu0 %v4621_v50  ;;  %1646 = vmatpush1.bf16.msra.mxu1 %v4640_v0 }
 0x149   :  { %1647 = vmatprep.subr.bf16.mxu1 %v4648_v8 }
 0x14b   :  { %1607 = vmatpush1.bf16.msra.mxu0 %v4619_v51 }
 0x14c   :  { %1608 = vmatprep.subr.bf16.mxu0 %v4624_v52  ;;  %1648 = vmatpush1.bf16.msra.mxu1 %v4646_v7 }
 0x14d   :  { %1649 = vmatprep.subr.bf16.mxu1 %v4654_v10 }
 0x14f   :  { %1609 = vmatpush1.bf16.msra.mxu0 %v4622_v2 }
 0x150   :  { %1610 = vmatprep.subr.bf16.mxu0 %v4627_v53  ;;  %1650 = vmatpush1.bf16.msra.mxu1 %v4652_v14 }
 0x151   :  { %1651 = vmatprep.subr.bf16.mxu1 %v4660_v17  ;;  %v4699_v17 = vld [vmem:[#allocation11 + $0x7bc] ss:$24 sps:$4 sm:$0xff]  }
 0x152   :  { %v578_v50 = vpop.xlane.xlu0 %577 }
 0x153   :  { %1611 = vmatpush1.bf16.msra.mxu0 %v4625_v54  ;;  %v579_v51 = vmax.f32 %v578_v50, 1e-09  ;;  %v4750_v50 = vld [vmem:[#allocation11 + $0x66c] ss:$24 sps:$4 sm:$0xff]  }
 0x154   :  { %1612 = vmatprep.subr.bf16.mxu0 %v4630_v55  ;;  %1652 = vmatpush1.bf16.msra.mxu1 %v4658_v21  ;;  %v4697_v21 = vld [vmem:[#allocation11 + $0x7b8] ss:$24 sps:$4 sm:$0xff]  }
 0x155   :  { %1653 = vmatprep.subr.bf16.mxu1 %v4666_v23  ;;  %v4705_v23 = vld [vmem:[#allocation11 + $0x7ec] ss:$24 sps:$4 sm:$0xff]  }
 0x157   :  { %1613 = vmatpush1.bf16.msra.mxu0 %v4628_v56  ;;  %v434_v42 = vpop.xlane.xlu1 %433 }
 0x158   :  { %1614 = vmatprep.subr.bf16.mxu0 %v4633_v57  ;;  %1654 = vmatpush1.bf16.msra.mxu1 %v4664_v27  ;;  %v435_v30 = vmax.f32 %v434_v42, 1e-09  ;;  %v4703_v27 = vld [vmem:[#allocation11 + $0x7e8] ss:$24 sps:$4 sm:$0xff]  }
 0x159   :  { %1655 = vmatprep.subr.bf16.mxu1 %v4672_v28  ;;  %v4711_v28 = vld [vmem:[#allocation11 + $0x81c] ss:$24 sps:$4 sm:$0xff]   ;;  %v4727_v42 = vld [vmem:[#allocation11 + $0x8a8] ss:$24 sps:$4 sm:$0xff]  }
 0x15a   :  { %5264 = vrcp.f32 %v435_v30  ;;  %v4735_v30 = vld [vmem:[#allocation11 + $0x8dc] ss:$24 sps:$4 sm:$0xff]  }
 0x15b   :  { %1615 = vmatpush1.bf16.msra.mxu0 %v4631_v58  ;;  %5266 = vrcp.f32 %v579_v51  ;;  %v4745_v51 = vld [vmem:[#allocation11 + $0x4c0] ss:$24 sps:$4 sm:$0xff]  }
 0x15c   :  { %1616 = vmatprep.subr.bf16.mxu0 %v4636_v59  ;;  %1656 = vmatpush1.bf16.msra.mxu1 %v4670_v16  ;;  %v4709_v16 = vld [vmem:[#allocation11 + $0x818] ss:$24 sps:$4 sm:$0xff]  }
 0x15d   :  { %1657 = vmatprep.subr.bf16.mxu1 %v4678_v29  ;;  %v4717_v29 = vld [vmem:[#allocation11 + $0x84c] ss:$24 sps:$4 sm:$0xff]  }
 0x15f   :  { %1617 = vmatpush1.bf16.msra.mxu0 %v4634_v60 }
 0x160   :  { %1618 = vmatprep.subr.bf16.mxu0 %v4639_v61  ;;  %1658 = vmatpush1.bf16.msra.mxu1 %v4676_v37  ;;  %v4715_v37 = vld [vmem:[#allocation11 + $0x848] ss:$24 sps:$4 sm:$0xff]  }
 0x161   :  { %1659 = vmatprep.subr.bf16.mxu1 %v4684_v18  ;;  %v4718_v18 = vld [vmem:[#allocation11 + $0x578] ss:$24 sps:$4 sm:$0xff]  }
 0x163   :  { %1619 = vmatpush1.bf16.msra.mxu0 %v4637_v62 }
 0x164   :  { %1620 = vmatprep.subr.bf16.mxu0 %v4645_v6  ;;  %1660 = vmatpush1.bf16.msra.mxu1 %v4682_v22  ;;  %v5265_v43 = vpop.eup %5264  ;;  %v4726_v22 = vld [vmem:[#allocation11 + $0x5ac] ss:$24 sps:$4 sm:$0xff]  }
 0x165   :  { %1686 = vmatprep.subr.bf16.mxu1 %v4690_v40  ;;  %v5267_v52 = vpop.eup %5266  ;;  %v4724_v40 = vld [vmem:[#allocation11 + $0x5a8] ss:$24 sps:$4 sm:$0xff]  }
 0x167   :  { %1621 = vmatpush1.bf16.msra.mxu0 %v4643_v1 }
 0x168   :  { %1622 = vmatprep.subr.bf16.mxu0 %v4651_v9 }
 0x16b   :  { %1623 = vmatpush1.bf16.msra.mxu0 %v4649_v11  ;;  %v4691_v11 = vld [vmem:[#allocation11 + $0x788] ss:$24 sps:$4 sm:$0xff]  }
 0x16c   :  { %1624 = vmatprep.subr.bf16.mxu0 %v4657_v13  ;;  %v4696_v13 = vld [vmem:[#allocation11 + $0x4bc] ss:$24 sps:$4 sm:$0xff]  }
 0x16f   :  { %1625 = vmatpush1.bf16.msra.mxu0 %v4655_v19  ;;  %v4694_v19 = vld [vmem:[#allocation11 + $0x4b8] ss:$24 sps:$4 sm:$0xff]  }
 0x170   :  { %1626 = vmatprep.subr.bf16.mxu0 %v4663_v20  ;;  %v4702_v20 = vld [vmem:[#allocation11 + $0x4ec] ss:$24 sps:$4 sm:$0xff]  }
 0x173   :  { %1627 = vmatpush1.bf16.msra.mxu0 %v4661_v24  ;;  %v4700_v24 = vld [vmem:[#allocation11 + $0x4e8] ss:$24 sps:$4 sm:$0xff]  }
 0x174   :  { %1628 = vmatprep.subr.bf16.mxu0 %v4669_v26  ;;  %v4708_v26 = vld [vmem:[#allocation11 + $0x51c] ss:$24 sps:$4 sm:$0xff]  }
 0x177   :  { %1629 = vmatpush1.bf16.msra.mxu0 %v4667_v12  ;;  %v4706_v12 = vld [vmem:[#allocation11 + $0x518] ss:$24 sps:$4 sm:$0xff]  }
 0x178   :  { %1630 = vmatprep.subr.bf16.mxu0 %v4675_v15  ;;  %v4714_v15 = vld [vmem:[#allocation11 + $0x54c] ss:$24 sps:$4 sm:$0xff]  }
 0x17b   :  { %1631 = vmatpush1.bf16.msra.mxu0 %v4673_v35  ;;  %v4712_v35 = vld [vmem:[#allocation11 + $0x548] ss:$24 sps:$4 sm:$0xff]  }
 0x17c   :  { %1632 = vmatprep.subr.bf16.mxu0 %v4681_v36  ;;  %v4720_v36 = vld [vmem:[#allocation11 + $0x57c] ss:$24 sps:$4 sm:$0xff]  }
 0x17f   :  { %1633 = vmatpush1.bf16.msra.mxu0 %v4679_v38  ;;  %v4723_v38 = vld [vmem:[#allocation11 + $0x87c] ss:$24 sps:$4 sm:$0xff]  }
 0x180   :  { %1634 = vmatprep.subr.bf16.mxu0 %v4687_v25  ;;  %v4721_v25 = vld [vmem:[#allocation11 + $0x878] ss:$24 sps:$4 sm:$0xff]  }
 0x183   :  { %1635 = vmatpush1.bf16.msra.mxu0 %v4685_v39  ;;  %v4729_v39 = vld [vmem:[#allocation11 + $0x8ac] ss:$24 sps:$4 sm:$0xff]  }
 0x184   :  { %1727 = vmatprep.subr.bf16.mxu0 %v4693_v41  ;;  %v4732_v41 = vld [vmem:[#allocation11 + $0x5dc] ss:$24 sps:$4 sm:$0xff]  }
 0x1f9   :  { %v384_v44 = vpop.f32.mrb[0].mxu0  ;;  %v425_v32 = vpop.f32.mrb[0].mxu1 }
 0x1fa   :  { %v5727_v33 = vmul.f32 %v5265_v43, %v384_v44  ;;  %v386_v34 = vpop.f32.mrb[1].mxu0  ;;  %v4547_v45 = vpop.f32.mrb[1].mxu1  ;;  %v5729_v54 = vmul.f32 %v5265_v43, %v425_v32  ;;  %v4738_v44 = vld [vmem:[#allocation11 + $0x60c] ss:$24 sps:$4 sm:$0xff]   ;;  %v4733_v32 = vld [vmem:[#allocation11 + $0x8d8] ss:$24 sps:$4 sm:$0xff]  }
 0x1fb   :  { %v388_v46 = vpop.f32.mrb[2].mxu0  ;;  %v428_v47 = vpop.f32.mrb[2].mxu1  ;;  %v5731_v59 = vmul.f32 %v5265_v43, %v386_v34  ;;  %v4730_v43 = vld [vmem:[#allocation11 + $0x5d8] ss:$24 sps:$4 sm:$0xff]   ;;  %v4741_v34 = vld [vmem:[#allocation11 + $0x494] ss:$24 sps:$4 sm:$0xff]  }
 0x1fc   :  { %v389_v48 = vpop.f32.mrb[3].mxu0  ;;  %v4548_v49 = vpop.f32.mrb[3].mxu1  ;;  %v4736_v45 = vld [vmem:[#allocation11 + $0x608] ss:$24 sps:$4 sm:$0xff]   ;;  %v4744_v46 = vld [vmem:[#allocation11 + $0x63c] ss:$24 sps:$4 sm:$0xff]  }
 0x1fd   :  { %v4739_v47 = vld [vmem:[#allocation11 + $0x490] ss:$24 sps:$4 sm:$0xff]   ;;  %v4747_v48 = vld [vmem:[#allocation11 + $0x4c4] ss:$24 sps:$4 sm:$0xff]  }
 0x1fe   :  { %v4742_v49 = vld [vmem:[#allocation11 + $0x638] ss:$24 sps:$4 sm:$0xff]  }
 0x219   :  { %v529_v2 = vpop.f32.mrb[4].mxu0  ;;  %v570_v53 = vpop.f32.mrb[4].mxu1 }
 0x21a   :  { %v581_v55 = vmul.f32 %v5267_v52, %v529_v2  ;;  %v583_v56 = vmul.f32 %v5267_v52, %v570_v53  ;;  %v531_v57 = vpop.f32.mrb[5].mxu0  ;;  %v4567_v58 = vpop.f32.mrb[5].mxu1  ;;  %v4748_v2 = vld [vmem:[#allocation11 + $0x668] ss:$24 sps:$4 sm:$0xff]   ;;  %v4756_v53 = vld [vmem:[#allocation11 + $0x69c] ss:$24 sps:$4 sm:$0xff]  }
 0x21b   :  { %v582_v60 = vmul.f32 %v5267_v52, %v531_v57  ;;  %v533_v61 = vpop.f32.mrb[6].mxu0  ;;  %v573_v62 = vpop.f32.mrb[6].mxu1  ;;  %v4753_v52 = vld [vmem:[#allocation11 + $0x4f4] ss:$24 sps:$4 sm:$0xff]   ;;  %v4754_v57 = vld [vmem:[#allocation11 + $0x698] ss:$24 sps:$4 sm:$0xff]  }
 0x21c   :  { %v5734_v0 = vmul.f32 %v581_v55, %v5727_v33  ;;  %v5737_v1 = vmul.f32 %v583_v56, %v5729_v54  ;;  %v5739_v6 = vpack.c.bf16 %v583_v56, %v583_v56  ;;  %v534_v7 = vpop.f32.mrb[7].mxu0  ;;  %v4568_v8 = vpop.f32.mrb[7].mxu1  ;;  %v5746_v14 = vpack.c.bf16 %v581_v55, %v581_v55  ;;  %v4751_v55 = vld [vmem:[#allocation11 + $0x4f0] ss:$24 sps:$4 sm:$0xff]   ;;  %v4759_v56 = vld [vmem:[#allocation11 + $0x524] ss:$24 sps:$4 sm:$0xff]  }
 0x21d   :  { %v5742_v9 = vmul.f32 %v582_v60, %v5731_v59  ;;  %v5744_v10 = vpack.c.bf16 %v582_v60, %v582_v60  ;;  %v4762_v58 = vld [vmem:[#allocation11 + $0x6cc] ss:$24 sps:$4 sm:$0xff]   ;;  %v4757_v60 = vld [vmem:[#allocation11 + $0x520] ss:$24 sps:$4 sm:$0xff]   ;;  %v4763_v7 = vld [vmem:[#allocation11 + $0x550] ss:$24 sps:$4 sm:$0xff]  }
 0x21e   :  { %1678 = vmatmul.mubr.bf16.vlgmr.msra.gmra.mrb[8].mxu1 %v5739_v6  ;;  %v4765_v61 = vld [vmem:[#allocation11 + $0x554] ss:$24 sps:$4 sm:$0xff]   ;;  %v4760_v62 = vld [vmem:[#allocation11 + $0x6c8] ss:$24 sps:$4 sm:$0xff]   ;;  %v4771_v8 = vld [vmem:[#allocation11 + $0x584] ss:$24 sps:$4 sm:$0xff]  }
 0x21f   :  { %1687 = vmatpush1.bf16.msra.mxu1 %v4688_v63  ;;  %1636 = vmatprep.mubr.bf16.mxu0 %v5744_v10  ;;  %v4768_v63 = vld [vmem:[#allocation11 + $0x6fc] ss:$24 sps:$4 sm:$0xff]  }
 0x220   :  { %1718 = vmatprep.mubr.bf16.mxu1 %v5744_v10  ;;  %1637 = vmatmul.mubr.bf16.vlgmr.msra.gmra.mrb[8].mxu0 %v5746_v14 }
 0x221   :  { %1728 = vmatpush1.bf16.msra.mxu0 %v4691_v11  ;;  %1688 = vmatprep.subr.bf16.mxu1 %v4696_v13  ;;  %v4774_v11 = vld [vmem:[#allocation11 + $0x72c] ss:$24 sps:$4 sm:$0xff]   ;;  %v4769_v13 = vld [vmem:[#allocation11 + $0x580] ss:$24 sps:$4 sm:$0xff]  }
 0x222   :  { %1729 = vmatprep.subr.bf16.mxu0 %v4699_v17  ;;  %1759 = vmatprep.mubr.bf16.mxu0 %v5484_v31  ;;  %v4777_v17 = vld [vmem:[#allocation11 + $0x5b4] ss:$24 sps:$4 sm:$0xff]  }
 0x223   :  { %1689 = vmatpush1.bf16.msra.mxu1 %v4694_v19  ;;  %v4772_v19 = vld [vmem:[#allocation11 + $0x728] ss:$24 sps:$4 sm:$0xff]  }
 0x224   :  { %1690 = vmatprep.subr.bf16.mxu1 %v4702_v20  ;;  %v4780_v20 = vld [vmem:[#allocation11 + $0x75c] ss:$24 sps:$4 sm:$0xff]  }
 0x225   :  { %1730 = vmatpush1.bf16.msra.mxu0 %v4697_v21  ;;  %v4775_v21 = vld [vmem:[#allocation11 + $0x5b0] ss:$24 sps:$4 sm:$0xff]  }
 0x226   :  { %1731 = vmatprep.subr.bf16.mxu0 %v4705_v23  ;;  %v4783_v23 = vld [vmem:[#allocation11 + $0x5e4] ss:$24 sps:$4 sm:$0xff]  }
 0x227   :  { %1691 = vmatpush1.bf16.msra.mxu1 %v4700_v24  ;;  %v4778_v24 = vld [vmem:[#allocation11 + $0x758] ss:$24 sps:$4 sm:$0xff]  }
 0x228   :  { %1692 = vmatprep.subr.bf16.mxu1 %v4708_v26  ;;  %v4786_v26 = vld [vmem:[#allocation11 + $0x794] ss:$24 sps:$4 sm:$0xff]  }
 0x229   :  { %1732 = vmatpush1.bf16.msra.mxu0 %v4703_v27  ;;  %v4781_v27 = vld [vmem:[#allocation11 + $0x5e0] ss:$24 sps:$4 sm:$0xff]  }
 0x22a   :  { %1733 = vmatprep.subr.bf16.mxu0 %v4711_v28  ;;  %v4789_v28 = vld [vmem:[#allocation11 + $0x614] ss:$24 sps:$4 sm:$0xff]  }
 0x22b   :  { %1693 = vmatpush1.bf16.msra.mxu1 %v4706_v12  ;;  %v4784_v12 = vld [vmem:[#allocation11 + $0x790] ss:$24 sps:$4 sm:$0xff]  }
 0x22c   :  { %1694 = vmatprep.subr.bf16.mxu1 %v4714_v15  ;;  %v4792_v15 = vld [vmem:[#allocation11 + $0x7c4] ss:$24 sps:$4 sm:$0xff]  }
 0x22d   :  { %1734 = vmatpush1.bf16.msra.mxu0 %v4709_v16  ;;  %v4787_v16 = vld [vmem:[#allocation11 + $0x610] ss:$24 sps:$4 sm:$0xff]  }
 0x22e   :  { %1735 = vmatprep.subr.bf16.mxu0 %v4717_v29  ;;  %v4795_v29 = vld [vmem:[#allocation11 + $0x644] ss:$24 sps:$4 sm:$0xff]  }
 0x22f   :  { %1695 = vmatpush1.bf16.msra.mxu1 %v4712_v35  ;;  %v4790_v35 = vld [vmem:[#allocation11 + $0x7c0] ss:$24 sps:$4 sm:$0xff]  }
 0x230   :  { %1696 = vmatprep.subr.bf16.mxu1 %v4720_v36  ;;  %v4798_v36 = vld [vmem:[#allocation11 + $0x7f4] ss:$24 sps:$4 sm:$0xff]  }
 0x231   :  { %1736 = vmatpush1.bf16.msra.mxu0 %v4715_v37  ;;  %v4793_v37 = vld [vmem:[#allocation11 + $0x640] ss:$24 sps:$4 sm:$0xff]  }
 0x232   :  { %1737 = vmatprep.subr.bf16.mxu0 %v4723_v38  ;;  %v4801_v38 = vld [vmem:[#allocation11 + $0x674] ss:$24 sps:$4 sm:$0xff]  }
 0x233   :  { %1697 = vmatpush1.bf16.msra.mxu1 %v4718_v18  ;;  %v4796_v18 = vld [vmem:[#allocation11 + $0x7f0] ss:$24 sps:$4 sm:$0xff]  }
 0x234   :  { %1698 = vmatprep.subr.bf16.mxu1 %v4726_v22  ;;  %v4804_v22 = vld [vmem:[#allocation11 + $0x824] ss:$24 sps:$4 sm:$0xff]  }
 0x235   :  { %1738 = vmatpush1.bf16.msra.mxu0 %v4721_v25  ;;  %v4799_v25 = vld [vmem:[#allocation11 + $0x670] ss:$24 sps:$4 sm:$0xff]  }
 0x236   :  { %1739 = vmatprep.subr.bf16.mxu0 %v4729_v39  ;;  %v4807_v39 = vld [vmem:[#allocation11 + $0x6a4] ss:$24 sps:$4 sm:$0xff]  }
 0x237   :  { %1699 = vmatpush1.bf16.msra.mxu1 %v4724_v40  ;;  %v4802_v40 = vld [vmem:[#allocation11 + $0x820] ss:$24 sps:$4 sm:$0xff]  }
 0x238   :  { %1700 = vmatprep.subr.bf16.mxu1 %v4732_v41  ;;  %v4810_v41 = vld [vmem:[#allocation11 + $0x854] ss:$24 sps:$4 sm:$0xff]  }
 0x239   :  { %1740 = vmatpush1.bf16.msra.mxu0 %v4727_v42  ;;  %v4805_v42 = vld [vmem:[#allocation11 + $0x6a0] ss:$24 sps:$4 sm:$0xff]  }
 0x23a   :  { %1741 = vmatprep.subr.bf16.mxu0 %v4735_v30  ;;  %v4813_v30 = vld [vmem:[#allocation11 + $0x6d4] ss:$24 sps:$4 sm:$0xff]  }
 0x23b   :  { %1701 = vmatpush1.bf16.msra.mxu1 %v4730_v43  ;;  %v4808_v43 = vld [vmem:[#allocation11 + $0x850] ss:$24 sps:$4 sm:$0xff]  }
 0x23c   :  { %1702 = vmatprep.subr.bf16.mxu1 %v4738_v44  ;;  %v4816_v44 = vld [vmem:[#allocation11 + $0x884] ss:$24 sps:$4 sm:$0xff]  }
 0x23d   :  { %1742 = vmatpush1.bf16.msra.mxu0 %v4733_v32  ;;  %v4811_v32 = vld [vmem:[#allocation11 + $0x6d0] ss:$24 sps:$4 sm:$0xff]  }
 0x23e   :  { %1768 = vmatprep.subr.bf16.mxu0 %v4741_v34  ;;  %v4819_v34 = vld [vmem:[#allocation11 + $0x704] ss:$24 sps:$4 sm:$0xff]  }
 0x23f   :  { %1703 = vmatpush1.bf16.msra.mxu1 %v4736_v45  ;;  %v4814_v45 = vld [vmem:[#allocation11 + $0x880] ss:$24 sps:$4 sm:$0xff]  }
 0x240   :  { %1760 = vmatmul.mubr.bf16.vlgmr.msra.gmra.mrb[12].mxu0 %v5739_v6  ;;  %1704 = vmatprep.subr.bf16.mxu1 %v4744_v46  ;;  %v4822_v46 = vld [vmem:[#allocation11 + $0x8b4] ss:$24 sps:$4 sm:$0xff]  }
 0x241   :  { %1769 = vmatpush1.bf16.msra.mxu0 %v4739_v47  ;;  %1800 = vmatprep.mubr.bf16.mxu0 %v5744_v10  ;;  %v4766_v10 = vld [vmem:[#allocation11 + $0x6f8] ss:$24 sps:$4 sm:$0xff]  }
 0x242   :  { %1770 = vmatprep.subr.bf16.mxu0 %v4747_v48  ;;  %v4817_v47 = vld [vmem:[#allocation11 + $0x700] ss:$24 sps:$4 sm:$0xff]   ;;  %v4825_v48 = vld [vmem:[#allocation11 + $0x734] ss:$24 sps:$4 sm:$0xff]  }
 0x243   :  { %1705 = vmatpush1.bf16.msra.mxu1 %v4742_v49  ;;  %v4820_v49 = vld [vmem:[#allocation11 + $0x8b0] ss:$24 sps:$4 sm:$0xff]  }
 0x244   :  { %1706 = vmatprep.subr.bf16.mxu1 %v4750_v50  ;;  %v4828_v50 = vld [vmem:[#allocation11 + $0x8e4] ss:$24 sps:$4 sm:$0xff]  }
 0x245   :  { %1771 = vmatpush1.bf16.msra.mxu0 %v4745_v51  ;;  %v4823_v51 = vld [vmem:[#allocation11 + $0x730] ss:$24 sps:$4 sm:$0xff]  }
 0x246   :  { %1772 = vmatprep.subr.bf16.mxu0 %v4753_v52  ;;  %v4831_v52 = vld [vmem:[#allocation11 + $0x764] ss:$24 sps:$4 sm:$0xff]  }
 0x247   :  { %1707 = vmatpush1.bf16.msra.mxu1 %v4748_v2  ;;  %v4826_v2 = vld [vmem:[#allocation11 + $0x8e0] ss:$24 sps:$4 sm:$0xff]  }
 0x248   :  { %1708 = vmatprep.subr.bf16.mxu1 %v4756_v53  ;;  %v4834_v53 = vld [vmem:[#allocation11 + $0x4] ss:$24 sps:$4 sm:$0xff]  }
 0x249   :  { %1773 = vmatpush1.bf16.msra.mxu0 %v4751_v55  ;;  %v4829_v55 = vld [vmem:[#allocation11 + $0x760] ss:$24 sps:$4 sm:$0xff]  }
 0x24a   :  { %1774 = vmatprep.subr.bf16.mxu0 %v4759_v56  ;;  %v4837_v56 = vld [vmem:[#allocation11 + $0x304] ss:$24 sps:$4 sm:$0xff]  }
 0x24b   :  { %1709 = vmatpush1.bf16.msra.mxu1 %v4754_v57  ;;  %v4832_v57 = vld [vmem:[#allocation11] ss:$24 sps:$4 sm:$0xff]  }
 0x24c   :  { %1710 = vmatprep.subr.bf16.mxu1 %v4762_v58  ;;  %v4840_v58 = vld [vmem:[#allocation11 + $0x34] ss:$24 sps:$4 sm:$0xff]  }
 0x24d   :  { %1775 = vmatpush1.bf16.msra.mxu0 %v4757_v60  ;;  %v5759_v60 = vpack.c.bf16 %v5731_v59, %v5731_v59  ;;  %v4849_v59 = vld [vmem:[#allocation11 + $0x364] ss:$24 sps:$4 sm:$0xff]  }
 0x24e   :  { %1776 = vmatprep.subr.bf16.mxu0 %v4765_v61  ;;  %v4835_v61 = vld [vmem:[#allocation11 + $0x300] ss:$24 sps:$4 sm:$0xff]  }
 0x24f   :  { %1711 = vmatpush1.bf16.msra.mxu1 %v4760_v62  ;;  %v4843_v62 = vld [vmem:[#allocation11 + $0x334] ss:$24 sps:$4 sm:$0xff]  }
 0x250   :  { %1712 = vmatprep.subr.bf16.mxu1 %v4768_v63  ;;  %v4838_v63 = vld [vmem:[#allocation11 + $0x30] ss:$24 sps:$4 sm:$0xff]  }
 0x251   :  { %1777 = vmatpush1.bf16.msra.mxu0 %v4763_v7  ;;  %v4846_v7 = vld [vmem:[#allocation11 + $0x64] ss:$24 sps:$4 sm:$0xff]  }
 0x252   :  { %1778 = vmatprep.subr.bf16.mxu0 %v4771_v8  ;;  %v4841_v8 = vld [vmem:[#allocation11 + $0x330] ss:$24 sps:$4 sm:$0xff]  }
 0x253   :  { %1713 = vmatpush1.bf16.msra.mxu1 %v4766_v10  ;;  %v4844_v10 = vld [vmem:[#allocation11 + $0x60] ss:$24 sps:$4 sm:$0xff]  }
 0x254   :  { %1714 = vmatprep.subr.bf16.mxu1 %v4774_v11  ;;  %v4847_v11 = vld [vmem:[#allocation11 + $0x360] ss:$24 sps:$4 sm:$0xff]  }
 0x255   :  { %1779 = vmatpush1.bf16.msra.mxu0 %v4769_v13  ;;  %v4855_v13 = vld [vmem:[#allocation11 + $0x394] ss:$24 sps:$4 sm:$0xff]  }
 0x256   :  { %1780 = vmatprep.subr.bf16.mxu0 %v4777_v17  ;;  %v4850_v17 = vld [vmem:[#allocation11 + $0x90] ss:$24 sps:$4 sm:$0xff]  }
 0x257   :  { %1715 = vmatpush1.bf16.msra.mxu1 %v4772_v19  ;;  %v4853_v19 = vld [vmem:[#allocation11 + $0x390] ss:$24 sps:$4 sm:$0xff]  }
 0x258   :  { %1716 = vmatprep.subr.bf16.mxu1 %v4780_v20  ;;  %v4861_v20 = vld [vmem:[#allocation11 + $0x3c4] ss:$24 sps:$4 sm:$0xff]  }
 0x259   :  { %1781 = vmatpush1.bf16.msra.mxu0 %v4775_v21  ;;  %v4856_v21 = vld [vmem:[#allocation11 + $0xc0] ss:$24 sps:$4 sm:$0xff]  }
 0x25a   :  { %1782 = vmatprep.subr.bf16.mxu0 %v4783_v23  ;;  %v4864_v23 = vld [vmem:[#allocation11 + $0xf4] ss:$24 sps:$4 sm:$0xff]  }
 0x25b   :  { %1717 = vmatpush1.bf16.msra.mxu1 %v4778_v24  ;;  %v4859_v24 = vld [vmem:[#allocation11 + $0x3c0] ss:$24 sps:$4 sm:$0xff]  }
 0x25c   :  { %1809 = vmatprep.subr.bf16.mxu1 %v4786_v26  ;;  %v4867_v26 = vld [vmem:[#allocation11 + $0x3f4] ss:$24 sps:$4 sm:$0xff]  }
 0x25d   :  { %1783 = vmatpush1.bf16.msra.mxu0 %v4781_v27  ;;  %v4862_v27 = vld [vmem:[#allocation11 + $0xf0] ss:$24 sps:$4 sm:$0xff]  }
 0x25e   :  { %1719 = vmatmul.mubr.bf16.vlgmr.msra.gmra.mrb[12].mxu1 %v5746_v14  ;;  %1784 = vmatprep.subr.bf16.mxu0 %v4789_v28  ;;  %v4870_v28 = vld [vmem:[#allocation11 + $0x124] ss:$24 sps:$4 sm:$0xff]  }
 0x25f   :  { %1810 = vmatpush1.bf16.msra.mxu1 %v4784_v12  ;;  %1841 = vmatprep.mubr.bf16.mxu1 %v5484_v31  ;;  %v4865_v12 = vld [vmem:[#allocation11 + $0x3f0] ss:$24 sps:$4 sm:$0xff]  }
 0x260   :  { %1811 = vmatprep.subr.bf16.mxu1 %v4792_v15  ;;  %v4873_v15 = vld [vmem:[#allocation11 + $0x424] ss:$24 sps:$4 sm:$0xff]  }
 0x261   :  { %1785 = vmatpush1.bf16.msra.mxu0 %v4787_v16  ;;  %v4868_v16 = vld [vmem:[#allocation11 + $0x120] ss:$24 sps:$4 sm:$0xff]  }
 0x262   :  { %1786 = vmatprep.subr.bf16.mxu0 %v4795_v29  ;;  %v4876_v29 = vld [vmem:[#allocation11 + $0x154] ss:$24 sps:$4 sm:$0xff]  }
 0x263   :  { %1812 = vmatpush1.bf16.msra.mxu1 %v4790_v35  ;;  %v4871_v35 = vld [vmem:[#allocation11 + $0x420] ss:$24 sps:$4 sm:$0xff]  }
 0x264   :  { %1813 = vmatprep.subr.bf16.mxu1 %v4798_v36  ;;  %v4879_v36 = vld [vmem:[#allocation11 + $0x454] ss:$24 sps:$4 sm:$0xff]  }
 0x265   :  { %1787 = vmatpush1.bf16.msra.mxu0 %v4793_v37  ;;  %v4874_v37 = vld [vmem:[#allocation11 + $0x150] ss:$24 sps:$4 sm:$0xff]  }
 0x266   :  { %1788 = vmatprep.subr.bf16.mxu0 %v4801_v38  ;;  %v4882_v38 = vld [vmem:[#allocation11 + $0x184] ss:$24 sps:$4 sm:$0xff]  }
 0x267   :  { %1814 = vmatpush1.bf16.msra.mxu1 %v4796_v18  ;;  %v4877_v18 = vld [vmem:[#allocation11 + $0x450] ss:$24 sps:$4 sm:$0xff]  }
 0x268   :  { %1815 = vmatprep.subr.bf16.mxu1 %v4804_v22  ;;  %v4885_v22 = vld [vmem:[#allocation11 + $0xc] ss:$24 sps:$4 sm:$0xff]  }
 0x269   :  { %1789 = vmatpush1.bf16.msra.mxu0 %v4799_v25  ;;  %v4880_v25 = vld [vmem:[#allocation11 + $0x180] ss:$24 sps:$4 sm:$0xff]  }
 0x26a   :  { %1790 = vmatprep.subr.bf16.mxu0 %v4807_v39  ;;  %v4888_v39 = vld [vmem:[#allocation11 + $0x1b4] ss:$24 sps:$4 sm:$0xff]  }
 0x26b   :  { %1816 = vmatpush1.bf16.msra.mxu1 %v4802_v40  ;;  %v4883_v40 = vld [vmem:[#allocation11 + $0x8] ss:$24 sps:$4 sm:$0xff]  }
 0x26c   :  { %1817 = vmatprep.subr.bf16.mxu1 %v4810_v41  ;;  %v5767_v41 = vpack.c.bf16 %v5729_v54, %v5729_v54  ;;  %v4895_v54 = vld [vmem:[#allocation11 + $0x68] ss:$24 sps:$4 sm:$0xff]  }
 0x26d   :  { %1791 = vmatpush1.bf16.msra.mxu0 %v4805_v42  ;;  %v4891_v42 = vld [vmem:[#allocation11 + $0x3c] ss:$24 sps:$4 sm:$0xff]  }
 0x26e   :  { %1792 = vmatprep.subr.bf16.mxu0 %v4813_v30  ;;  %v4886_v30 = vld [vmem:[#allocation11 + $0x1b0] ss:$24 sps:$4 sm:$0xff]  }
 0x26f   :  { %1818 = vmatpush1.bf16.msra.mxu1 %v4808_v43  ;;  %v4894_v43 = vld [vmem:[#allocation11 + $0x1e4] ss:$24 sps:$4 sm:$0xff]  }
 0x270   :  { %1819 = vmatprep.subr.bf16.mxu1 %v4816_v44  ;;  %v4889_v44 = vld [vmem:[#allocation11 + $0x38] ss:$24 sps:$4 sm:$0xff]  }
 0x271   :  { %1793 = vmatpush1.bf16.msra.mxu0 %v4811_v32  ;;  %v4897_v32 = vld [vmem:[#allocation11 + $0x6c] ss:$24 sps:$4 sm:$0xff]  }
 0x272   :  { %1794 = vmatprep.subr.bf16.mxu0 %v4819_v34  ;;  %v4892_v34 = vld [vmem:[#allocation11 + $0x1e0] ss:$24 sps:$4 sm:$0xff]  }
 0x273   :  { %1820 = vmatpush1.bf16.msra.mxu1 %v4814_v45  ;;  %v4900_v45 = vld [vmem:[#allocation11 + $0x214] ss:$24 sps:$4 sm:$0xff]  }
 0x274   :  { %1821 = vmatprep.subr.bf16.mxu1 %v4822_v46  ;;  %v4903_v46 = vld [vmem:[#allocation11 + $0x9c] ss:$24 sps:$4 sm:$0xff]  }
 0x275   :  { %1795 = vmatpush1.bf16.msra.mxu0 %v4817_v47  ;;  %v4898_v47 = vld [vmem:[#allocation11 + $0x210] ss:$24 sps:$4 sm:$0xff]  }
 0x276   :  { %1796 = vmatprep.subr.bf16.mxu0 %v4825_v48  ;;  %v4906_v48 = vld [vmem:[#allocation11 + $0x244] ss:$24 sps:$4 sm:$0xff]  }
 0x277   :  { %1822 = vmatpush1.bf16.msra.mxu1 %v4820_v49  ;;  %v4901_v49 = vld [vmem:[#allocation11 + $0x98] ss:$24 sps:$4 sm:$0xff]  }
 0x278   :  { %1823 = vmatprep.subr.bf16.mxu1 %v4828_v50  ;;  %v4909_v50 = vld [vmem:[#allocation11 + $0xcc] ss:$24 sps:$4 sm:$0xff]  }
 0x279   :  { %1797 = vmatpush1.bf16.msra.mxu0 %v4823_v51  ;;  %v4904_v51 = vld [vmem:[#allocation11 + $0x240] ss:$24 sps:$4 sm:$0xff]  }
 0x27a   :  { %1798 = vmatprep.subr.bf16.mxu0 %v4831_v52  ;;  %v4912_v52 = vld [vmem:[#allocation11 + $0x274] ss:$24 sps:$4 sm:$0xff]  }
 0x27b   :  { %1824 = vmatpush1.bf16.msra.mxu1 %v4826_v2  ;;  %v4907_v2 = vld [vmem:[#allocation11 + $0xc8] ss:$24 sps:$4 sm:$0xff]  }
 0x27c   :  { %2570 = vmatprep.subr.bf16.mxu1 %v4834_v53  ;;  %v4915_v53 = vld [vmem:[#allocation11 + $0xfc] ss:$24 sps:$4 sm:$0xff]  }
 0x27d   :  { %1799 = vmatpush1.bf16.msra.mxu0 %v4829_v55  ;;  %v4910_v55 = vld [vmem:[#allocation11 + $0x270] ss:$24 sps:$4 sm:$0xff]  }
 0x27e   :  { %1842 = vmatmul.mubr.bf16.vlgmr.msra.gmra.mrb[16].mxu1 %v5739_v6  ;;  %2611 = vmatprep.subr.bf16.mxu0 %v4837_v56  ;;  %v4852_v6 = vld [vmem:[#allocation11 + $0x94] ss:$24 sps:$4 sm:$0xff]   ;;  %v4918_v56 = vld [vmem:[#allocation11 + $0x2a4] ss:$24 sps:$4 sm:$0xff]  }
 0x27f   :  { %2571 = vmatpush1.bf16.msra.mxu1 %v4832_v57  ;;  %2602 = vmatprep.mubr.bf16.mxu1 %v5759_v60  ;;  %v4913_v57 = vld [vmem:[#allocation11 + $0xf8] ss:$24 sps:$4 sm:$0xff]  }
 0x280   :  { %1801 = vmatmul.mubr.bf16.vlgmr.msra.gmra.mrb[16].mxu0 %v5746_v14  ;;  %2572 = vmatprep.subr.bf16.mxu1 %v4840_v58  ;;  %v4858_v14 = vld [vmem:[#allocation11 + $0xc4] ss:$24 sps:$4 sm:$0xff]  }
 0x281   :  { %2612 = vmatpush1.bf16.msra.mxu0 %v4835_v61  ;;  %2643 = vmatprep.mubr.bf16.mxu0 %v5484_v31  ;;  %v4921_v58 = vld [vmem:[#allocation11 + $0x12c] ss:$24 sps:$4 sm:$0xff]   ;;  %v4916_v61 = vld [vmem:[#allocation11 + $0x2a0] ss:$24 sps:$4 sm:$0xff]  }
 0x282   :  { %2613 = vmatprep.subr.bf16.mxu0 %v4843_v62  ;;  %v4924_v62 = vld [vmem:[#allocation11 + $0x2d4] ss:$24 sps:$4 sm:$0xff]  }
 0x283   :  { %2573 = vmatpush1.bf16.msra.mxu1 %v4838_v63  ;;  %v4919_v63 = vld [vmem:[#allocation11 + $0x128] ss:$24 sps:$4 sm:$0xff]  }
 0x284   :  { %2574 = vmatprep.subr.bf16.mxu1 %v4846_v7  ;;  %v4927_v7 = vld [vmem:[#allocation11 + $0x15c] ss:$24 sps:$4 sm:$0xff]  }
 0x285   :  { %2614 = vmatpush1.bf16.msra.mxu0 %v4841_v8  ;;  %v4922_v8 = vld [vmem:[#allocation11 + $0x2d0] ss:$24 sps:$4 sm:$0xff]  }
 0x286   :  { %2615 = vmatprep.subr.bf16.mxu0 %v4849_v59  ;;  %v4930_v59 = vld [vmem:[#allocation11 + $0x30c] ss:$24 sps:$4 sm:$0xff]  }
 0x287   :  { %2575 = vmatpush1.bf16.msra.mxu1 %v4844_v10  ;;  %v4925_v10 = vld [vmem:[#allocation11 + $0x158] ss:$24 sps:$4 sm:$0xff]  }
 0x288   :  { %2576 = vmatprep.subr.bf16.mxu1 %v4852_v6  ;;  %v4933_v6 = vld [vmem:[#allocation11 + $0x18c] ss:$24 sps:$4 sm:$0xff]  }
 0x289   :  { %2616 = vmatpush1.bf16.msra.mxu0 %v4847_v11  ;;  %v4928_v11 = vld [vmem:[#allocation11 + $0x308] ss:$24 sps:$4 sm:$0xff]  }
 0x28a   :  { %2617 = vmatprep.subr.bf16.mxu0 %v4855_v13  ;;  %v5773_v13 = vpack.c.bf16 %v5727_v33, %v5727_v33  ;;  %v4940_v33 = vld [vmem:[#allocation11 + $0x368] ss:$24 sps:$4 sm:$0xff]  }
 0x28b   :  { %2577 = vmatpush1.bf16.msra.mxu1 %v4850_v17  ;;  %v4936_v17 = vld [vmem:[#allocation11 + $0x33c] ss:$24 sps:$4 sm:$0xff]  }
 0x28c   :  { %2578 = vmatprep.subr.bf16.mxu1 %v4858_v14  ;;  %v4931_v14 = vld [vmem:[#allocation11 + $0x188] ss:$24 sps:$4 sm:$0xff]  }
 0x28d   :  { %2618 = vmatpush1.bf16.msra.mxu0 %v4853_v19  ;;  %v4939_v19 = vld [vmem:[#allocation11 + $0x1bc] ss:$24 sps:$4 sm:$0xff]  }
 0x28e   :  { %2619 = vmatprep.subr.bf16.mxu0 %v4861_v20  ;;  %v4934_v20 = vld [vmem:[#allocation11 + $0x338] ss:$24 sps:$4 sm:$0xff]  }
 0x28f   :  { %2579 = vmatpush1.bf16.msra.mxu1 %v4856_v21  ;;  %v4942_v21 = vld [vmem:[#allocation11 + $0x36c] ss:$24 sps:$4 sm:$0xff]  }
 0x290   :  { %2580 = vmatprep.subr.bf16.mxu1 %v4864_v23  ;;  %v4937_v23 = vld [vmem:[#allocation11 + $0x1b8] ss:$24 sps:$4 sm:$0xff]  }
 0x291   :  { %2620 = vmatpush1.bf16.msra.mxu0 %v4859_v24  ;;  %v4945_v24 = vld [vmem:[#allocation11 + $0x1ec] ss:$24 sps:$4 sm:$0xff]  }
 0x292   :  { %2621 = vmatprep.subr.bf16.mxu0 %v4867_v26  ;;  %v4948_v26 = vld [vmem:[#allocation11 + $0x39c] ss:$24 sps:$4 sm:$0xff]  }
 0x293   :  { %2581 = vmatpush1.bf16.msra.mxu1 %v4862_v27  ;;  %v4943_v27 = vld [vmem:[#allocation11 + $0x1e8] ss:$24 sps:$4 sm:$0xff]  }
 0x294   :  { %2582 = vmatprep.subr.bf16.mxu1 %v4870_v28  ;;  %v4951_v28 = vld [vmem:[#allocation11 + $0x21c] ss:$24 sps:$4 sm:$0xff]  }
 0x295   :  { %2622 = vmatpush1.bf16.msra.mxu0 %v4865_v12  ;;  %v4946_v12 = vld [vmem:[#allocation11 + $0x398] ss:$24 sps:$4 sm:$0xff]  }
 0x296   :  { %2623 = vmatprep.subr.bf16.mxu0 %v4873_v15  ;;  %v4954_v15 = vld [vmem:[#allocation11 + $0x3cc] ss:$24 sps:$4 sm:$0xff]  }
 0x297   :  { %2583 = vmatpush1.bf16.msra.mxu1 %v4868_v16  ;;  %v4949_v16 = vld [vmem:[#allocation11 + $0x218] ss:$24 sps:$4 sm:$0xff]  }
 0x298   :  { %2584 = vmatprep.subr.bf16.mxu1 %v4876_v29  ;;  %v4957_v29 = vld [vmem:[#allocation11 + $0x24c] ss:$24 sps:$4 sm:$0xff]  }
 0x299   :  { %2624 = vmatpush1.bf16.msra.mxu0 %v4871_v35  ;;  %v4952_v35 = vld [vmem:[#allocation11 + $0x3c8] ss:$24 sps:$4 sm:$0xff]  }
 0x29a   :  { %2625 = vmatprep.subr.bf16.mxu0 %v4879_v36  ;;  %v4960_v36 = vld [vmem:[#allocation11 + $0x3fc] ss:$24 sps:$4 sm:$0xff]  }
 0x29b   :  { %2585 = vmatpush1.bf16.msra.mxu1 %v4874_v37  ;;  %v4955_v37 = vld [vmem:[#allocation11 + $0x248] ss:$24 sps:$4 sm:$0xff]  }
 0x29c   :  { %2586 = vmatprep.subr.bf16.mxu1 %v4882_v38  ;;  %v4963_v38 = vld [vmem:[#allocation11 + $0x27c] ss:$24 sps:$4 sm:$0xff]  }
 0x29d   :  { %2626 = vmatpush1.bf16.msra.mxu0 %v4877_v18  ;;  %v4958_v18 = vld [vmem:[#allocation11 + $0x3f8] ss:$24 sps:$4 sm:$0xff]  }
 0x29e   :  { %2652 = vmatprep.subr.bf16.mxu0 %v4885_v22  ;;  %v4966_v22 = vld [vmem:[#allocation11 + $0x42c] ss:$24 sps:$4 sm:$0xff]  }
 0x29f   :  { %2587 = vmatpush1.bf16.msra.mxu1 %v4880_v25  ;;  %v4961_v25 = vld [vmem:[#allocation11 + $0x278] ss:$24 sps:$4 sm:$0xff]  }
 0x2a0   :  { %2644 = vmatmul.mubr.bf16.vlgmr.msra.gmra.mrb[20].mxu0 %v5767_v41  ;;  %2588 = vmatprep.subr.bf16.mxu1 %v4888_v39  ;;  %v4969_v39 = vld [vmem:[#allocation11 + $0x2ac] ss:$24 sps:$4 sm:$0xff]  }
 0x2a1   :  { %2653 = vmatpush1.bf16.msra.mxu0 %v4883_v40  ;;  %2684 = vmatprep.mubr.bf16.mxu0 %v5759_v60  ;;  %v4964_v40 = vld [vmem:[#allocation11 + $0x428] ss:$24 sps:$4 sm:$0xff]  }
 0x2a2   :  { %2654 = vmatprep.subr.bf16.mxu0 %v4891_v42  ;;  %v4972_v42 = vld [vmem:[#allocation11 + $0x45c] ss:$24 sps:$4 sm:$0xff]  }
 0x2a3   :  { %2589 = vmatpush1.bf16.msra.mxu1 %v4886_v30  ;;  %v4967_v30 = vld [vmem:[#allocation11 + $0x2a8] ss:$24 sps:$4 sm:$0xff]  }
 0x2a4   :  { %2590 = vmatprep.subr.bf16.mxu1 %v4894_v43  ;;  %v4975_v43 = vld [vmem:[#allocation11 + $0x2dc] ss:$24 sps:$4 sm:$0xff]  }
 0x2a5   :  { %2655 = vmatpush1.bf16.msra.mxu0 %v4889_v44  ;;  %v4970_v44 = vld [vmem:[#allocation11 + $0x458] ss:$24 sps:$4 sm:$0xff]  }
 0x2a6   :  { %2656 = vmatprep.subr.bf16.mxu0 %v4897_v32  ;;  %v4978_v32 = vld [vmem:[#allocation11 + $0x14] ss:$24 sps:$4 sm:$0xff]  }
 0x2a7   :  { %2591 = vmatpush1.bf16.msra.mxu1 %v4892_v34  ;;  %v4973_v34 = vld [vmem:[#allocation11 + $0x2d8] ss:$24 sps:$4 sm:$0xff]  }
 0x2a8   :  { %2592 = vmatprep.subr.bf16.mxu1 %v4900_v45  ;;  %v4981_v45 = vld [vmem:[#allocation11 + $0x314] ss:$24 sps:$4 sm:$0xff]  }
 0x2a9   :  { %2657 = vmatpush1.bf16.msra.mxu0 %v4895_v54  ;;  %v4976_v54 = vld [vmem:[#allocation11 + $0x10] ss:$24 sps:$4 sm:$0xff]  }
 0x2aa   :  { %2658 = vmatprep.subr.bf16.mxu0 %v4903_v46  ;;  %v4984_v46 = vld [vmem:[#allocation11 + $0x44] ss:$24 sps:$4 sm:$0xff]  }
 0x2ab   :  { %2593 = vmatpush1.bf16.msra.mxu1 %v4898_v47  ;;  %v4979_v47 = vld [vmem:[#allocation11 + $0x310] ss:$24 sps:$4 sm:$0xff]  }
 0x2ac   :  { %2594 = vmatprep.subr.bf16.mxu1 %v4906_v48  ;;  %v4987_v48 = vld [vmem:[#allocation11 + $0x344] ss:$24 sps:$4 sm:$0xff]  }
 0x2ad   :  { %2659 = vmatpush1.bf16.msra.mxu0 %v4901_v49  ;;  %v4982_v49 = vld [vmem:[#allocation11 + $0x40] ss:$24 sps:$4 sm:$0xff]  }
 0x2ae   :  { %2660 = vmatprep.subr.bf16.mxu0 %v4909_v50  ;;  %v4990_v50 = vld [vmem:[#allocation11 + $0x74] ss:$24 sps:$4 sm:$0xff]  }
 0x2af   :  { %2595 = vmatpush1.bf16.msra.mxu1 %v4904_v51  ;;  %v4985_v51 = vld [vmem:[#allocation11 + $0x340] ss:$24 sps:$4 sm:$0xff]  }
 0x2b0   :  { %2596 = vmatprep.subr.bf16.mxu1 %v4912_v52  ;;  %v4993_v52 = vld [vmem:[#allocation11 + $0x374] ss:$24 sps:$4 sm:$0xff]  }
 0x2b1   :  { %2661 = vmatpush1.bf16.msra.mxu0 %v4907_v2  ;;  %v4988_v2 = vld [vmem:[#allocation11 + $0x70] ss:$24 sps:$4 sm:$0xff]  }
 0x2b2   :  { %2662 = vmatprep.subr.bf16.mxu0 %v4915_v53  ;;  %v4996_v53 = vld [vmem:[#allocation11 + $0xa4] ss:$24 sps:$4 sm:$0xff]  }
 0x2b3   :  { %2597 = vmatpush1.bf16.msra.mxu1 %v4910_v55  ;;  %v4991_v55 = vld [vmem:[#allocation11 + $0x370] ss:$24 sps:$4 sm:$0xff]  }
 0x2b4   :  { %2598 = vmatprep.subr.bf16.mxu1 %v4918_v56  ;;  %v4999_v56 = vld [vmem:[#allocation11 + $0x3a4] ss:$24 sps:$4 sm:$0xff]  }
 0x2b5   :  { %2663 = vmatpush1.bf16.msra.mxu0 %v4913_v57  ;;  %v5002_v57 = vld [vmem:[#allocation11 + $0xd4] ss:$24 sps:$4 sm:$0xff]  }
 0x2b6   :  { %2664 = vmatprep.subr.bf16.mxu0 %v4921_v58  ;;  %v4997_v58 = vld [vmem:[#allocation11 + $0x3a0] ss:$24 sps:$4 sm:$0xff]  }
 0x2b7   :  { %2599 = vmatpush1.bf16.msra.mxu1 %v4916_v61  ;;  %v5005_v61 = vld [vmem:[#allocation11 + $0x3d4] ss:$24 sps:$4 sm:$0xff]  }
 0x2b8   :  { %2600 = vmatprep.subr.bf16.mxu1 %v4924_v62  ;;  %v5000_v62 = vld [vmem:[#allocation11 + $0xd0] ss:$24 sps:$4 sm:$0xff]  }
 0x2b9   :  { %2665 = vmatpush1.bf16.msra.mxu0 %v4919_v63  ;;  %v5008_v63 = vld [vmem:[#allocation11 + $0x104] ss:$24 sps:$4 sm:$0xff]  }
 0x2ba   :  { %2666 = vmatprep.subr.bf16.mxu0 %v4927_v7  ;;  %v5003_v7 = vld [vmem:[#allocation11 + $0x3d0] ss:$24 sps:$4 sm:$0xff]  }
 0x2bb   :  { %2601 = vmatpush1.bf16.msra.mxu1 %v4922_v8  ;;  %v5011_v8 = vld [vmem:[#allocation11 + $0x404] ss:$24 sps:$4 sm:$0xff]  }
 0x2bc   :  { %2693 = vmatprep.subr.bf16.mxu1 %v4930_v59  ;;  %v5006_v59 = vld [vmem:[#allocation11 + $0x100] ss:$24 sps:$4 sm:$0xff]  }
 0x2bd   :  { %2667 = vmatpush1.bf16.msra.mxu0 %v4925_v10  ;;  %v5014_v10 = vld [vmem:[#allocation11 + $0x134] ss:$24 sps:$4 sm:$0xff]  }
 0x2be   :  { %2603 = vmatmul.mubr.bf16.vlgmr.msra.gmra.mrb[20].mxu1 %v5773_v13  ;;  %2668 = vmatprep.subr.bf16.mxu0 %v4933_v6 }
 0x2bf   :  { %2694 = vmatpush1.bf16.msra.mxu1 %v4928_v11  ;;  %2725 = vmatprep.mubr.bf16.mxu1 %v5484_v31  ;;  %v5009_v11 = vld [vmem:[#allocation11 + $0x400] ss:$24 sps:$4 sm:$0xff]  }
 0x2c0   :  { %2695 = vmatprep.subr.bf16.mxu1 %v4936_v17 }
 0x2c1   :  { %2669 = vmatpush1.bf16.msra.mxu0 %v4931_v14  ;;  %v5017_v14 = vld [vmem:[#allocation11 + $0x434] ss:$24 sps:$4 sm:$0xff]  }
 0x2c2   :  { %2670 = vmatprep.subr.bf16.mxu0 %v4939_v19 }
 0x2c3   :  { %2696 = vmatpush1.bf16.msra.mxu1 %v4934_v20 }
 0x2c4   :  { %2697 = vmatprep.subr.bf16.mxu1 %v4942_v21  ;;  %v5012_v21 = vld [vmem:[#allocation11 + $0x130] ss:$24 sps:$4 sm:$0xff]  }
 0x2c5   :  { %2671 = vmatpush1.bf16.msra.mxu0 %v4937_v23 }
 0x2c6   :  { %2672 = vmatprep.subr.bf16.mxu0 %v4945_v24 }
 0x2c7   :  { %2698 = vmatpush1.bf16.msra.mxu1 %v4940_v33 }
 0x2c8   :  { %2699 = vmatprep.subr.bf16.mxu1 %v4948_v26  ;;  %v5020_v26 = vld [vmem:[#allocation11 + $0x164] ss:$24 sps:$4 sm:$0xff]  }
 0x2c9   :  { %2673 = vmatpush1.bf16.msra.mxu0 %v4943_v27 }
 0x2ca   :  { %2674 = vmatprep.subr.bf16.mxu0 %v4951_v28 }
 0x2cb   :  { %2700 = vmatpush1.bf16.msra.mxu1 %v4946_v12  ;;  %v5015_v12 = vld [vmem:[#allocation11 + $0x430] ss:$24 sps:$4 sm:$0xff]  }
 0x2cc   :  { %2701 = vmatprep.subr.bf16.mxu1 %v4954_v15 }
 0x2cd   :  { %2675 = vmatpush1.bf16.msra.mxu0 %v4949_v16  ;;  %v5023_v16 = vld [vmem:[#allocation11 + $0x464] ss:$24 sps:$4 sm:$0xff]  }
 0x2ce   :  { %2676 = vmatprep.subr.bf16.mxu0 %v4957_v29  ;;  %v5018_v29 = vld [vmem:[#allocation11 + $0x160] ss:$24 sps:$4 sm:$0xff]  }
 0x2cf   :  { %2702 = vmatpush1.bf16.msra.mxu1 %v4952_v35  ;;  %v5026_v35 = vld [vmem:[#allocation11 + $0x194] ss:$24 sps:$4 sm:$0xff]  }
 0x2d0   :  { %2703 = vmatprep.subr.bf16.mxu1 %v4960_v36  ;;  %v5021_v36 = vld [vmem:[#allocation11 + $0x460] ss:$24 sps:$4 sm:$0xff]  }
 0x2d1   :  { %2677 = vmatpush1.bf16.msra.mxu0 %v4955_v37  ;;  %v5029_v37 = vld [vmem:[#allocation11 + $0x904] ss:$24 sps:$4 sm:$0xff]  }
 0x2d2   :  { %2678 = vmatprep.subr.bf16.mxu0 %v4963_v38  ;;  %v5024_v38 = vld [vmem:[#allocation11 + $0x190] ss:$24 sps:$4 sm:$0xff]  }
 0x2d3   :  { %2704 = vmatpush1.bf16.msra.mxu1 %v4958_v18  ;;  %v5032_v18 = vld [vmem:[#allocation11 + $0x1c4] ss:$24 sps:$4 sm:$0xff]  }
 0x2d4   :  { %2705 = vmatprep.subr.bf16.mxu1 %v4966_v22  ;;  %v5027_v22 = vld [vmem:[#allocation11 + $0x900] ss:$24 sps:$4 sm:$0xff]  }
 0x2d5   :  { %2679 = vmatpush1.bf16.msra.mxu0 %v4961_v25  ;;  %v5035_v25 = vld [vmem:[#allocation11 + $0x934] ss:$24 sps:$4 sm:$0xff]  }
 0x2d6   :  { %2680 = vmatprep.subr.bf16.mxu0 %v4969_v39  ;;  %v5787_v39 = vpack.c.bf16 %v5742_v9, %v5742_v9  ;;  %v5047_v9 = vld [vmem:[#allocation11 + $0x994] ss:$24 sps:$4 sm:$0xff]  }
 0x2d7   :  { %2706 = vmatpush1.bf16.msra.mxu1 %v4964_v40  ;;  %v5030_v40 = vld [vmem:[#allocation11 + $0x1c0] ss:$24 sps:$4 sm:$0xff]  }
 0x2d8   :  { %2707 = vmatprep.subr.bf16.mxu1 %v4972_v42  ;;  %v5038_v42 = vld [vmem:[#allocation11 + $0x1f4] ss:$24 sps:$4 sm:$0xff]  }
 0x2d9   :  { %2681 = vmatpush1.bf16.msra.mxu0 %v4967_v30  ;;  %v5033_v30 = vld [vmem:[#allocation11 + $0x930] ss:$24 sps:$4 sm:$0xff]  }
 0x2da   :  { %2682 = vmatprep.subr.bf16.mxu0 %v4975_v43  ;;  %v5041_v43 = vld [vmem:[#allocation11 + $0x964] ss:$24 sps:$4 sm:$0xff]  }
 0x2db   :  { %2708 = vmatpush1.bf16.msra.mxu1 %v4970_v44  ;;  %v5036_v44 = vld [vmem:[#allocation11 + $0x1f0] ss:$24 sps:$4 sm:$0xff]  }
 0x2dc   :  { %2734 = vmatprep.subr.bf16.mxu1 %v4978_v32  ;;  %v5044_v32 = vld [vmem:[#allocation11 + $0x224] ss:$24 sps:$4 sm:$0xff]  }
 0x2dd   :  { %2683 = vmatpush1.bf16.msra.mxu0 %v4973_v34  ;;  %v5039_v34 = vld [vmem:[#allocation11 + $0x960] ss:$24 sps:$4 sm:$0xff]  }
 0x2de   :  { %2726 = vmatmul.mubr.bf16.vlgmr.msra.gmra.mrb[24].mxu1 %v5767_v41  ;;  %2775 = vmatprep.subr.bf16.mxu0 %v4981_v45  ;;  %v5042_v45 = vld [vmem:[#allocation11 + $0x220] ss:$24 sps:$4 sm:$0xff]  }
 0x2df   :  { %2735 = vmatpush1.bf16.msra.mxu1 %v4976_v54  ;;  %2766 = vmatprep.mubr.bf16.mxu1 %v5759_v60  ;;  %v4994_v60 = vld [vmem:[#allocation11 + $0xa0] ss:$24 sps:$4 sm:$0xff]   ;;  %v5045_v54 = vld [vmem:[#allocation11 + $0x990] ss:$24 sps:$4 sm:$0xff]  }
 0x2e0   :  { %2685 = vmatmul.mubr.bf16.vlgmr.msra.gmra.mrb[24].mxu0 %v5773_v13  ;;  %2736 = vmatprep.subr.bf16.mxu1 %v4984_v46  ;;  %v5053_v46 = vld [vmem:[#allocation11 + $0x9c4] ss:$24 sps:$4 sm:$0xff]  }
 0x2e1   :  { %2776 = vmatpush1.bf16.msra.mxu0 %v4979_v47  ;;  %2807 = vmatprep.mubr.bf16.mxu0 %v5484_v31  ;;  %v5048_v47 = vld [vmem:[#allocation11 + $0x250] ss:$24 sps:$4 sm:$0xff]  }
 0x2e2   :  { %2777 = vmatprep.subr.bf16.mxu0 %v4987_v48  ;;  %v5056_v48 = vld [vmem:[#allocation11 + $0x284] ss:$24 sps:$4 sm:$0xff]  }
 0x2e3   :  { %2737 = vmatpush1.bf16.msra.mxu1 %v4982_v49  ;;  %v5051_v49 = vld [vmem:[#allocation11 + $0x9c0] ss:$24 sps:$4 sm:$0xff]  }
 0x2e4   :  { %2738 = vmatprep.subr.bf16.mxu1 %v4990_v50  ;;  %v5059_v50 = vld [vmem:[#allocation11 + $0x9f4] ss:$24 sps:$4 sm:$0xff]  }
 0x2e5   :  { %2778 = vmatpush1.bf16.msra.mxu0 %v4985_v51  ;;  %v5054_v51 = vld [vmem:[#allocation11 + $0x280] ss:$24 sps:$4 sm:$0xff]  }
 0x2e6   :  { %2779 = vmatprep.subr.bf16.mxu0 %v4993_v52  ;;  %v5062_v52 = vld [vmem:[#allocation11 + $0x2b4] ss:$24 sps:$4 sm:$0xff]  }
 0x2e7   :  { %2739 = vmatpush1.bf16.msra.mxu1 %v4988_v2  ;;  %v5057_v2 = vld [vmem:[#allocation11 + $0x9f0] ss:$24 sps:$4 sm:$0xff]  }
 0x2e8   :  { %2740 = vmatprep.subr.bf16.mxu1 %v4996_v53  ;;  %v5065_v53 = vld [vmem:[#allocation11 + $0xa24] ss:$24 sps:$4 sm:$0xff]  }
 0x2e9   :  { %2780 = vmatpush1.bf16.msra.mxu0 %v4991_v55 }
 0x2ea   :  { %2781 = vmatprep.subr.bf16.mxu0 %v4999_v56  ;;  %v5060_v56 = vld [vmem:[#allocation11 + $0x2b0] ss:$24 sps:$4 sm:$0xff]  }
 0x2eb   :  { %2741 = vmatpush1.bf16.msra.mxu1 %v4994_v60 }
 0x2ec   :  { %2742 = vmatprep.subr.bf16.mxu1 %v5002_v57  ;;  %v5068_v57 = vld [vmem:[#allocation11 + $0x2e4] ss:$24 sps:$4 sm:$0xff]  }
 0x2ed   :  { %2782 = vmatpush1.bf16.msra.mxu0 %v4997_v58 }
 0x2ee   :  { %2783 = vmatprep.subr.bf16.mxu0 %v5005_v61  ;;  %v5063_v61 = vld [vmem:[#allocation11 + $0xa20] ss:$24 sps:$4 sm:$0xff]  }
 0x2ef   :  { %2743 = vmatpush1.bf16.msra.mxu1 %v5000_v62 }
 0x2f0   :  { %2744 = vmatprep.subr.bf16.mxu1 %v5008_v63  ;;  %v5071_v63 = vld [vmem:[#allocation11 + $0xa54] ss:$24 sps:$4 sm:$0xff]  }
 0x2f1   :  { %2784 = vmatpush1.bf16.msra.mxu0 %v5003_v7  ;;  %v1679_v6 = vpop.f32.mrb[8].mxu1  ;;  %v5066_v7 = vld [vmem:[#allocation11 + $0x2e0] ss:$24 sps:$4 sm:$0xff]  }
 0x2f2   :  { %v1681_v17 = vpop.f32.mrb[9].mxu1  ;;  %2785 = vmatprep.subr.bf16.mxu0 %v5011_v8  ;;  %v5074_v8 = vld [vmem:[#allocation11 + $0xc04] ss:$24 sps:$4 sm:$0xff]  }
 0x2f3   :  { %2745 = vmatpush1.bf16.msra.mxu1 %v5006_v59  ;;  %v1638_v19 = vpop.f32.mrb[8].mxu0  ;;  %v1683_v20 = vpop.f32.mrb[10].mxu1  ;;  %v5069_v59 = vld [vmem:[#allocation11 + $0xa50] ss:$24 sps:$4 sm:$0xff]  }
 0x2f4   :  { %v5781_v23 = vadd.f32 %v1679_v6, %v1638_v19  ;;  %v1640_v24 = vpop.f32.mrb[9].mxu0  ;;  %v1684_v33 = vpop.f32.mrb[11].mxu1  ;;  %2746 = vmatprep.subr.bf16.mxu1 %v5014_v10  ;;  %v5077_v10 = vld [vmem:[#allocation11 + $0xa84] ss:$24 sps:$4 sm:$0xff]   ;;  %v5072_v6 = vld [vmem:[#allocation11 + $0xc00] ss:$24 sps:$4 sm:$0xff]  }
 0x2f5   :  { %v5783_v27 = vadd.f32 %v1681_v17, %v1640_v24  ;;  %2786 = vmatpush1.bf16.msra.mxu0 %v5009_v11  ;;  %v1642_v28 = vpop.f32.mrb[10].mxu0  ;;  %v5080_v11 = vld [vmem:[#allocation11 + $0xc34] ss:$24 sps:$4 sm:$0xff]   ;;  %v5075_v17 = vld [vmem:[#allocation11 + $0xa80] ss:$24 sps:$4 sm:$0xff]  }
 0x2f6   :  { %v1643_v15 = vpop.f32.mrb[11].mxu0  ;;  %2787 = vmatprep.subr.bf16.mxu0 %v5017_v14  ;;  %v5083_v14 = vld [vmem:[#allocation11 + $0xab4] ss:$24 sps:$4 sm:$0xff]   ;;  %v5078_v19 = vld [vmem:[#allocation11 + $0xc30] ss:$24 sps:$4 sm:$0xff]  }
 0x2f7   :  { %2747 = vmatpush1.bf16.msra.mxu1 %v5012_v21  ;;  %v5086_v20 = vld [vmem:[#allocation11 + $0xc64] ss:$24 sps:$4 sm:$0xff]   ;;  %v5081_v21 = vld [vmem:[#allocation11 + $0xab0] ss:$24 sps:$4 sm:$0xff]   ;;  %v5084_v33 = vld [vmem:[#allocation11 + $0xc60] ss:$24 sps:$4 sm:$0xff]  }
 0x2f8   :  { %2748 = vmatprep.subr.bf16.mxu1 %v5020_v26  ;;  %v5089_v24 = vld [vmem:[#allocation11 + $0xae4] ss:$24 sps:$4 sm:$0xff]   ;;  %v5092_v26 = vld [vmem:[#allocation11 + $0xc94] ss:$24 sps:$4 sm:$0xff]   ;;  %v5087_v28 = vld [vmem:[#allocation11 + $0xae0] ss:$24 sps:$4 sm:$0xff]  }
 0x2f9   :  { %2788 = vmatpush1.bf16.msra.mxu0 %v5015_v12  ;;  %v5090_v12 = vld [vmem:[#allocation11 + $0xc90] ss:$24 sps:$4 sm:$0xff]   ;;  %v5098_v15 = vld [vmem:[#allocation11 + $0xcc4] ss:$24 sps:$4 sm:$0xff]  }
 0x2fa   :  { %2789 = vmatprep.subr.bf16.mxu0 %v5023_v16  ;;  %v5093_v16 = vld [vmem:[#allocation11 + $0xb10] ss:$24 sps:$4 sm:$0xff]  }
 0x2fb   :  { %2749 = vmatpush1.bf16.msra.mxu1 %v5018_v29  ;;  %v5101_v29 = vld [vmem:[#allocation11 + $0xb44] ss:$24 sps:$4 sm:$0xff]  }
 0x2fc   :  { %2750 = vmatprep.subr.bf16.mxu1 %v5026_v35  ;;  %v5096_v35 = vld [vmem:[#allocation11 + $0xcc0] ss:$24 sps:$4 sm:$0xff]  }
 0x2fd   :  { %2790 = vmatpush1.bf16.msra.mxu0 %v5021_v36  ;;  %v5104_v36 = vld [vmem:[#allocation11 + $0xcf4] ss:$24 sps:$4 sm:$0xff]  }
 0x2fe   :  { %3680 = vmatprep.subr.bf16.mxu0 %v5029_v37  ;;  %v5099_v37 = vld [vmem:[#allocation11 + $0xb40] ss:$24 sps:$4 sm:$0xff]  }
 0x2ff   :  { %2751 = vmatpush1.bf16.msra.mxu1 %v5024_v38  ;;  %v5107_v38 = vld [vmem:[#allocation11 + $0xb74] ss:$24 sps:$4 sm:$0xff]  }
 0x300   :  { %2808 = vmatmul.mubr.bf16.vlgmr.msra.gmra.mrb[28].mxu0 %v5767_v41  ;;  %2752 = vmatprep.subr.bf16.mxu1 %v5032_v18  ;;  %v5050_v41 = vld [vmem:[#allocation11 + $0x254] ss:$24 sps:$4 sm:$0xff]   ;;  %v5102_v18 = vld [vmem:[#allocation11 + $0xcf0] ss:$24 sps:$4 sm:$0xff]  }
 0x301   :  { %3681 = vmatpush1.bf16.msra.mxu0 %v5027_v22  ;;  %3712 = vmatprep.mubr.bf16.mxu0 %v5787_v39  ;;  %v5110_v22 = vld [vmem:[#allocation11 + $0xd24] ss:$24 sps:$4 sm:$0xff]  }
 0x302   :  { %3682 = vmatprep.subr.bf16.mxu0 %v5035_v25 }
 0x303   :  { %2753 = vmatpush1.bf16.msra.mxu1 %v5030_v40  ;;  %v5105_v40 = vld [vmem:[#allocation11 + $0xb70] ss:$24 sps:$4 sm:$0xff]  }
 0x304   :  { %2754 = vmatprep.subr.bf16.mxu1 %v5038_v42 }
 0x305   :  { %3683 = vmatpush1.bf16.msra.mxu0 %v5033_v30 }
 0x306   :  { %3684 = vmatprep.subr.bf16.mxu0 %v5041_v43  ;;  %v5113_v43 = vld [vmem:[#allocation11 + $0xba4] ss:$24 sps:$4 sm:$0xff]  }
 0x307   :  { %2755 = vmatpush1.bf16.msra.mxu1 %v5036_v44 }
 0x308   :  { %2756 = vmatprep.subr.bf16.mxu1 %v5044_v32 }
 0x309   :  { %3685 = vmatpush1.bf16.msra.mxu0 %v5039_v34  ;;  %v5108_v34 = vld [vmem:[#allocation11 + $0xd20] ss:$24 sps:$4 sm:$0xff]  }
 0x30a   :  { %3686 = vmatprep.subr.bf16.mxu0 %v5047_v9 }
 0x30b   :  { %2757 = vmatpush1.bf16.msra.mxu1 %v5042_v45  ;;  %v5116_v45 = vld [vmem:[#allocation11 + $0xd54] ss:$24 sps:$4 sm:$0xff]  }
 0x30c   :  { %2758 = vmatprep.subr.bf16.mxu1 %v5050_v41  ;;  %v5111_v41 = vld [vmem:[#allocation11 + $0xba0] ss:$24 sps:$4 sm:$0xff]  }
 0x30d   :  { %3687 = vmatpush1.bf16.msra.mxu0 %v5045_v54  ;;  %v5119_v54 = vld [vmem:[#allocation11 + $0xbd4] ss:$24 sps:$4 sm:$0xff]  }
 0x30e   :  { %3688 = vmatprep.subr.bf16.mxu0 %v5053_v46  ;;  %v5114_v46 = vld [vmem:[#allocation11 + $0xd50] ss:$24 sps:$4 sm:$0xff]  }
 0x30f   :  { %2759 = vmatpush1.bf16.msra.mxu1 %v5048_v47  ;;  %v5122_v47 = vld [vmem:[#allocation11 + $0x90c] ss:$24 sps:$4 sm:$0xff]  }
 0x310   :  { %2760 = vmatprep.subr.bf16.mxu1 %v5056_v48  ;;  %v5117_v48 = vld [vmem:[#allocation11 + $0xbd0] ss:$24 sps:$4 sm:$0xff]  }
 0x311   :  { %3689 = vmatpush1.bf16.msra.mxu0 %v5051_v49  ;;  %v5125_v49 = vld [vmem:[#allocation11 + $0xc0c] ss:$24 sps:$4 sm:$0xff]  }
 0x312   :  { %3690 = vmatprep.subr.bf16.mxu0 %v5059_v50  ;;  %v5120_v50 = vld [vmem:[#allocation11 + $0x908] ss:$24 sps:$4 sm:$0xff]  }
 0x313   :  { %v5791_v55 = vpop.f32.mrb[12].mxu0  ;;  %2761 = vmatpush1.bf16.msra.mxu1 %v5054_v51  ;;  %v5805_v51 = vpack.c.bf16 %v5737_v1, %v5737_v1  ;;  %v5134_v1 = vld [vmem:[#allocation11 + $0x96c] ss:$24 sps:$4 sm:$0xff]  }
 0x314   :  { %v5793_v60 = vpop.f32.mrb[13].mxu0  ;;  %2762 = vmatprep.subr.bf16.mxu1 %v5062_v52  ;;  %v5128_v52 = vld [vmem:[#allocation11 + $0x93c] ss:$24 sps:$4 sm:$0xff]  }
 0x315   :  { %v1765_v58 = vpop.f32.mrb[14].mxu0  ;;  %3691 = vmatpush1.bf16.msra.mxu0 %v5057_v2  ;;  %v5123_v2 = vld [vmem:[#allocation11 + $0xc08] ss:$24 sps:$4 sm:$0xff]  }
 0x316   :  { %v1766_v62 = vpop.f32.mrb[15].mxu0  ;;  %3692 = vmatprep.subr.bf16.mxu0 %v5065_v53  ;;  %v5809_v53 = vpack.c.bf16 %v5734_v0, %v5734_v0  ;;  %v5132_v0 = vld [vmem:[#allocation11 + $0x968] ss:$24 sps:$4 sm:$0xff]   ;;  %v5140_v58 = vld [vmem:[#allocation11 + $0x99c] ss:$24 sps:$4 sm:$0xff]  }
 0x317   :  { %2763 = vmatpush1.bf16.msra.mxu1 %v5060_v56  ;;  %v5126_v56 = vld [vmem:[#allocation11 + $0x938] ss:$24 sps:$4 sm:$0xff]   ;;  %v5143_v62 = vld [vmem:[#allocation11 + $0xc9c] ss:$24 sps:$4 sm:$0xff]  }
 0x318   :  { %2764 = vmatprep.subr.bf16.mxu1 %v5068_v57  ;;  %v5137_v57 = vld [vmem:[#allocation11 + $0xc6c] ss:$24 sps:$4 sm:$0xff]  }
 0x319   :  { %3693 = vmatpush1.bf16.msra.mxu0 %v5063_v61  ;;  %v5135_v61 = vld [vmem:[#allocation11 + $0xc68] ss:$24 sps:$4 sm:$0xff]  }
 0x31a   :  { %3694 = vmatprep.subr.bf16.mxu0 %v5071_v63  ;;  %v5138_v63 = vld [vmem:[#allocation11 + $0x998] ss:$24 sps:$4 sm:$0xff]  }
 0x31b   :  { %2765 = vmatpush1.bf16.msra.mxu1 %v5066_v7  ;;  %v5146_v7 = vld [vmem:[#allocation11 + $0x9cc] ss:$24 sps:$4 sm:$0xff]  }
 0x31c   :  { %3721 = vmatprep.subr.bf16.mxu1 %v5074_v8  ;;  %v5141_v8 = vld [vmem:[#allocation11 + $0xc98] ss:$24 sps:$4 sm:$0xff]  }
 0x31d   :  { %3695 = vmatpush1.bf16.msra.mxu0 %v5069_v59  ;;  %v5149_v59 = vld [vmem:[#allocation11 + $0xccc] ss:$24 sps:$4 sm:$0xff]  }
 0x31e   :  { %2767 = vmatmul.mubr.bf16.vlgmr.msra.gmra.mrb[28].mxu1 %v5773_v13  ;;  %3696 = vmatprep.subr.bf16.mxu0 %v5077_v10  ;;  %v5095_v13 = vld [vmem:[#allocation11 + $0xb14] ss:$24 sps:$4 sm:$0xff]   ;;  %v5144_v10 = vld [vmem:[#allocation11 + $0x9c8] ss:$24 sps:$4 sm:$0xff]  }
 0x31f   :  { %3722 = vmatpush1.bf16.msra.mxu1 %v5072_v6  ;;  %3753 = vmatprep.mubr.bf16.mxu1 %v5484_v31  ;;  %v5152_v6 = vld [vmem:[#allocation11 + $0x9fc] ss:$24 sps:$4 sm:$0xff]  }
 0x320   :  { %3723 = vmatprep.subr.bf16.mxu1 %v5080_v11  ;;  %v5147_v11 = vld [vmem:[#allocation11 + $0xcc8] ss:$24 sps:$4 sm:$0xff]  }
 0x321   :  { %3697 = vmatpush1.bf16.msra.mxu0 %v5075_v17  ;;  %v5155_v17 = vld [vmem:[#allocation11 + $0xcfc] ss:$24 sps:$4 sm:$0xff]  }
 0x322   :  { %3698 = vmatprep.subr.bf16.mxu0 %v5083_v14  ;;  %v5150_v14 = vld [vmem:[#allocation11 + $0x9f8] ss:$24 sps:$4 sm:$0xff]  }
 0x323   :  { %3724 = vmatpush1.bf16.msra.mxu1 %v5078_v19  ;;  %v5158_v19 = vld [vmem:[#allocation11 + $0xa2c] ss:$24 sps:$4 sm:$0xff]  }
 0x324   :  { %3725 = vmatprep.subr.bf16.mxu1 %v5086_v20 }
 0x325   :  { %3699 = vmatpush1.bf16.msra.mxu0 %v5081_v21  ;;  %v5153_v21 = vld [vmem:[#allocation11 + $0xcf8] ss:$24 sps:$4 sm:$0xff]  }
 0x326   :  { %3700 = vmatprep.subr.bf16.mxu0 %v5089_v24 }
 0x327   :  { %3726 = vmatpush1.bf16.msra.mxu1 %v5084_v33  ;;  %v5161_v33 = vld [vmem:[#allocation11 + $0xd2c] ss:$24 sps:$4 sm:$0xff]  }
 0x328   :  { %3727 = vmatprep.subr.bf16.mxu1 %v5092_v26 }
 0x329   :  { %3701 = vmatpush1.bf16.msra.mxu0 %v5087_v28 }
 0x32a   :  { %3702 = vmatprep.subr.bf16.mxu0 %v5095_v13  ;;  %v5156_v13 = vld [vmem:[#allocation11 + $0xa28] ss:$24 sps:$4 sm:$0xff]  }
 0x32b   :  { %3728 = vmatpush1.bf16.msra.mxu1 %v5090_v12 }
 0x32c   :  { %3729 = vmatprep.subr.bf16.mxu1 %v5098_v15 }
 0x32d   :  { %3703 = vmatpush1.bf16.msra.mxu0 %v5093_v16 }
 0x32e   :  { %3704 = vmatprep.subr.bf16.mxu0 %v5101_v29  ;;  %v5164_v29 = vld [vmem:[#allocation11 + $0xa5c] ss:$24 sps:$4 sm:$0xff]  }
 0x32f   :  { %3730 = vmatpush1.bf16.msra.mxu1 %v5096_v35 }
 0x330   :  { %3731 = vmatprep.subr.bf16.mxu1 %v5104_v36 }
 0x331   :  { %v1720_v25 = vpop.f32.mrb[12].mxu1  ;;  %3705 = vmatpush1.bf16.msra.mxu0 %v5099_v37  ;;  %v5159_v37 = vld [vmem:[#allocation11 + $0xd28] ss:$24 sps:$4 sm:$0xff]  }
 0x332   :  { %v5798_v42 = vadd.f32 %v5791_v55, %v1720_v25  ;;  %v1722_v30 = vpop.f32.mrb[13].mxu1  ;;  %3706 = vmatprep.subr.bf16.mxu0 %v5107_v38  ;;  %v5131_v55 = vld [vmem:[#allocation11 + $0xc3c] ss:$24 sps:$4 sm:$0xff]   ;;  %v5170_v25 = vld [vmem:[#allocation11 + $0xa8c] ss:$24 sps:$4 sm:$0xff]  }
 0x333   :  { %v5801_v44 = vadd.f32 %v5793_v60, %v1722_v30  ;;  %v1724_v32 = vpop.f32.mrb[14].mxu1  ;;  %3732 = vmatpush1.bf16.msra.mxu1 %v5102_v18  ;;  %v5129_v60 = vld [vmem:[#allocation11 + $0xc38] ss:$24 sps:$4 sm:$0xff]   ;;  %v5167_v18 = vld [vmem:[#allocation11 + $0xd5c] ss:$24 sps:$4 sm:$0xff]  }
 0x334   :  { %v1725_v9 = vpop.f32.mrb[15].mxu1  ;;  %3733 = vmatprep.subr.bf16.mxu1 %v5110_v22  ;;  %v5162_v22 = vld [vmem:[#allocation11 + $0xa58] ss:$24 sps:$4 sm:$0xff]   ;;  %v5173_v30 = vld [vmem:[#allocation11 + $0x914] ss:$24 sps:$4 sm:$0xff]  }
 0x335   :  { %3707 = vmatpush1.bf16.msra.mxu0 %v5105_v40  ;;  %v5165_v40 = vld [vmem:[#allocation11 + $0xd58] ss:$24 sps:$4 sm:$0xff]   ;;  %v5176_v32 = vld [vmem:[#allocation11 + $0xabc] ss:$24 sps:$4 sm:$0xff]  }
 0x336   :  { %3708 = vmatprep.subr.bf16.mxu0 %v5113_v43  ;;  %v5168_v43 = vld [vmem:[#allocation11 + $0xa88] ss:$24 sps:$4 sm:$0xff]   ;;  %v5179_v9 = vld [vmem:[#allocation11 + $0x944] ss:$24 sps:$4 sm:$0xff]  }
 0x337   :  { %3734 = vmatpush1.bf16.msra.mxu1 %v5108_v34  ;;  %v5171_v34 = vld [vmem:[#allocation11 + $0x910] ss:$24 sps:$4 sm:$0xff]  }
 0x338   :  { %3735 = vmatprep.subr.bf16.mxu1 %v5116_v45  ;;  %v5174_v45 = vld [vmem:[#allocation11 + $0xab8] ss:$24 sps:$4 sm:$0xff]  }
 0x339   :  { %3709 = vmatpush1.bf16.msra.mxu0 %v5111_v41  ;;  %v5182_v41 = vld [vmem:[#allocation11 + $0xaec] ss:$24 sps:$4 sm:$0xff]  }
 0x33a   :  { %3710 = vmatprep.subr.bf16.mxu0 %v5119_v54  ;;  %v5177_v54 = vld [vmem:[#allocation11 + $0x940] ss:$24 sps:$4 sm:$0xff]  }
 0x33b   :  { %3736 = vmatpush1.bf16.msra.mxu1 %v5114_v46  ;;  %v5185_v46 = vld [vmem:[#allocation11 + $0x974] ss:$24 sps:$4 sm:$0xff]  }
 0x33c   :  { %3762 = vmatprep.subr.bf16.mxu1 %v5122_v47  ;;  %v5180_v47 = vld [vmem:[#allocation11 + $0xae8] ss:$24 sps:$4 sm:$0xff]  }
 0x33d   :  { %3711 = vmatpush1.bf16.msra.mxu0 %v5117_v48  ;;  %v5188_v48 = vld [vmem:[#allocation11 + $0xb1c] ss:$24 sps:$4 sm:$0xff]  }
 0x33e   :  { %3754 = vmatmul.mubr.bf16.vlgmr.msra.gmra.mrb[32].mxu1 %v5805_v51  ;;  %3803 = vmatprep.subr.bf16.mxu0 %v5125_v49  ;;  %v5183_v49 = vld [vmem:[#allocation11 + $0x970] ss:$24 sps:$4 sm:$0xff]  }
 0x33f   :  { %3763 = vmatpush1.bf16.msra.mxu1 %v5120_v50  ;;  %3794 = vmatprep.mubr.bf16.mxu1 %v5787_v39  ;;  %v5191_v50 = vld [vmem:[#allocation11 + $0x9a4] ss:$24 sps:$4 sm:$0xff]  }
 0x340   :  { %3713 = vmatmul.mubr.bf16.vlgmr.msra.gmra.mrb[32].mxu0 %v5809_v53  ;;  %3764 = vmatprep.subr.bf16.mxu1 %v5128_v52  ;;  %v5186_v52 = vld [vmem:[#allocation11 + $0xb18] ss:$24 sps:$4 sm:$0xff]  }
 0x341   :  { %3804 = vmatpush1.bf16.msra.mxu0 %v5123_v2  ;;  %3835 = vmatprep.mubr.bf16.mxu0 %v5484_v31  ;;  %v5194_v2 = vld [vmem:[#allocation11 + $0xb4c] ss:$24 sps:$4 sm:$0xff]  }
 0x342   :  { %3805 = vmatprep.subr.bf16.mxu0 %v5131_v55  ;;  %v5189_v55 = vld [vmem:[#allocation11 + $0x9a0] ss:$24 sps:$4 sm:$0xff]  }
 0x343   :  { %3765 = vmatpush1.bf16.msra.mxu1 %v5126_v56  ;;  %v5197_v56 = vld [vmem:[#allocation11 + $0x9d4] ss:$24 sps:$4 sm:$0xff]  }
 0x344   :  { %3766 = vmatprep.subr.bf16.mxu1 %v5134_v1  ;;  %v5200_v1 = vld [vmem:[#allocation11 + $0xb7c] ss:$24 sps:$4 sm:$0xff]  }
 0x345   :  { %3806 = vmatpush1.bf16.msra.mxu0 %v5129_v60  ;;  %v5195_v60 = vld [vmem:[#allocation11 + $0x9d0] ss:$24 sps:$4 sm:$0xff]  }
 0x346   :  { %3807 = vmatprep.subr.bf16.mxu0 %v5137_v57  ;;  %v5203_v57 = vld [vmem:[#allocation11 + $0xa04] ss:$24 sps:$4 sm:$0xff]  }
 0x347   :  { %3767 = vmatpush1.bf16.msra.mxu1 %v5132_v0  ;;  %v5198_v0 = vld [vmem:[#allocation11 + $0xb78] ss:$24 sps:$4 sm:$0xff]  }
 0x348   :  { %3768 = vmatprep.subr.bf16.mxu1 %v5140_v58  ;;  %v5206_v58 = vld [vmem:[#allocation11 + $0xbac] ss:$24 sps:$4 sm:$0xff]  }
 0x349   :  { %3808 = vmatpush1.bf16.msra.mxu0 %v5135_v61  ;;  %v5201_v61 = vld [vmem:[#allocation11 + $0xa00] ss:$24 sps:$4 sm:$0xff]  }
 0x34a   :  { %3809 = vmatprep.subr.bf16.mxu0 %v5143_v62  ;;  %v5209_v62 = vld [vmem:[#allocation11 + $0xa34] ss:$24 sps:$4 sm:$0xff]  }
 0x34b   :  { %3769 = vmatpush1.bf16.msra.mxu1 %v5138_v63 }
 0x34c   :  { %3770 = vmatprep.subr.bf16.mxu1 %v5146_v7  ;;  %v5204_v7 = vld [vmem:[#allocation11 + $0xba8] ss:$24 sps:$4 sm:$0xff]  }
 0x34d   :  { %3810 = vmatpush1.bf16.msra.mxu0 %v5141_v8 }
 0x34e   :  { %3811 = vmatprep.subr.bf16.mxu0 %v5149_v59  ;;  %v5212_v59 = vld [vmem:[#allocation11 + $0xbdc] ss:$24 sps:$4 sm:$0xff]  }
 0x34f   :  { %3771 = vmatpush1.bf16.msra.mxu1 %v5144_v10 }
 0x350   :  { %3772 = vmatprep.subr.bf16.mxu1 %v5152_v6  ;;  %v5207_v6 = vld [vmem:[#allocation11 + $0xa30] ss:$24 sps:$4 sm:$0xff]  }
 0x351   :  { %v1843_v20 = vpop.f32.mrb[16].mxu1  ;;  %3812 = vmatpush1.bf16.msra.mxu0 %v5147_v11 }
 0x352   :  { %v1845_v24 = vpop.f32.mrb[17].mxu1  ;;  %3813 = vmatprep.subr.bf16.mxu0 %v5155_v17  ;;  %v5215_v17 = vld [vmem:[#allocation11 + $0xa64] ss:$24 sps:$4 sm:$0xff]  }
 0x353   :  { %v1802_v26 = vpop.f32.mrb[16].mxu0  ;;  %v1847_v28 = vpop.f32.mrb[18].mxu1  ;;  %3773 = vmatpush1.bf16.msra.mxu1 %v5150_v14  ;;  %v5210_v14 = vld [vmem:[#allocation11 + $0xbd8] ss:$24 sps:$4 sm:$0xff]  }
 0x354   :  { %v5815_v12 = vadd.f32 %v1843_v20, %v1802_v26  ;;  %v1804_v15 = vpop.f32.mrb[17].mxu0  ;;  %v1848_v16 = vpop.f32.mrb[19].mxu1  ;;  %3774 = vmatprep.subr.bf16.mxu1 %v5158_v19  ;;  %v5218_v19 = vld [vmem:[#allocation11 + $0xc14] ss:$24 sps:$4 sm:$0xff]   ;;  %v5213_v20 = vld [vmem:[#allocation11 + $0xa60] ss:$24 sps:$4 sm:$0xff]  }
 0x355   :  { %v5817_v35 = vadd.f32 %v1845_v24, %v1804_v15  ;;  %v1806_v36 = vpop.f32.mrb[18].mxu0  ;;  %3814 = vmatpush1.bf16.msra.mxu0 %v5153_v21  ;;  %v5221_v21 = vld [vmem:[#allocation11 + $0xa94] ss:$24 sps:$4 sm:$0xff]   ;;  %v5216_v24 = vld [vmem:[#allocation11 + $0xc10] ss:$24 sps:$4 sm:$0xff]  }
 0x356   :  { %v1807_v38 = vpop.f32.mrb[19].mxu0  ;;  %3815 = vmatprep.subr.bf16.mxu0 %v5161_v33  ;;  %v5224_v33 = vld [vmem:[#allocation11 + $0xc44] ss:$24 sps:$4 sm:$0xff]   ;;  %v5219_v26 = vld [vmem:[#allocation11 + $0xa90] ss:$24 sps:$4 sm:$0xff]  }
 0x357   :  { %3775 = vmatpush1.bf16.msra.mxu1 %v5156_v13  ;;  %v5227_v28 = vld [vmem:[#allocation11 + $0xac4] ss:$24 sps:$4 sm:$0xff]   ;;  %v5222_v13 = vld [vmem:[#allocation11 + $0xc40] ss:$24 sps:$4 sm:$0xff]   ;;  %v5230_v15 = vld [vmem:[#allocation11 + $0xc74] ss:$24 sps:$4 sm:$0xff]  }
 0x358   :  { %3776 = vmatprep.subr.bf16.mxu1 %v5164_v29  ;;  %v5225_v16 = vld [vmem:[#allocation11 + $0xac0] ss:$24 sps:$4 sm:$0xff]   ;;  %v5233_v29 = vld [vmem:[#allocation11 + $0xaf4] ss:$24 sps:$4 sm:$0xff]   ;;  %v5228_v36 = vld [vmem:[#allocation11 + $0xc70] ss:$24 sps:$4 sm:$0xff]  }
 0x359   :  { %3816 = vmatpush1.bf16.msra.mxu0 %v5159_v37  ;;  %v5236_v37 = vld [vmem:[#allocation11 + $0xca4] ss:$24 sps:$4 sm:$0xff]   ;;  %v5231_v38 = vld [vmem:[#allocation11 + $0xaf0] ss:$24 sps:$4 sm:$0xff]  }
 0x35a   :  { %3817 = vmatprep.subr.bf16.mxu0 %v5167_v18  ;;  %v5239_v18 = vld [vmem:[#allocation11 + $0xb24] ss:$24 sps:$4 sm:$0xff]  }
 0x35b   :  { %3777 = vmatpush1.bf16.msra.mxu1 %v5162_v22  ;;  %v5234_v22 = vld [vmem:[#allocation11 + $0xca0] ss:$24 sps:$4 sm:$0xff]  }
 0x35c   :  { %3778 = vmatprep.subr.bf16.mxu1 %v5170_v25  ;;  %v5242_v25 = vld [vmem:[#allocation11 + $0xcd4] ss:$24 sps:$4 sm:$0xff]  }
 0x35d   :  { %3818 = vmatpush1.bf16.msra.mxu0 %v5165_v40  ;;  %v5245_v40 = vld [vmem:[#allocation11 + $0xb54] ss:$24 sps:$4 sm:$0xff]  }
 0x35e   :  { %3844 = vmatprep.subr.bf16.mxu0 %v5173_v30  ;;  %v5240_v30 = vld [vmem:[#allocation11 + $0xcd0] ss:$24 sps:$4 sm:$0xff]  }
 0x35f   :  { %3779 = vmatpush1.bf16.msra.mxu1 %v5168_v43  ;;  %v5248_v43 = vld [vmem:[#allocation11 + $0xd04] ss:$24 sps:$4 sm:$0xff]  }
 0x360   :  { %3836 = vmatmul.mubr.bf16.vlgmr.msra.gmra.mrb[36].mxu0 %v5805_v51  ;;  %3780 = vmatprep.subr.bf16.mxu1 %v5176_v32  ;;  %v5243_v32 = vld [vmem:[#allocation11 + $0xb50] ss:$24 sps:$4 sm:$0xff]  }
 0x361   :  { %3845 = vmatpush1.bf16.msra.mxu0 %v5171_v34  ;;  %3876 = vmatprep.mubr.bf16.mxu0 %v5787_v39  ;;  %v5192_v39 = vld [vmem:[#allocation11 + $0xb48] ss:$24 sps:$4 sm:$0xff]   ;;  %v5251_v34 = vld [vmem:[#allocation11 + $0xb84] ss:$24 sps:$4 sm:$0xff]  }
 0x362   :  { %3846 = vmatprep.subr.bf16.mxu0 %v5179_v9  ;;  %v5246_v9 = vld [vmem:[#allocation11 + $0xd00] ss:$24 sps:$4 sm:$0xff]  }
 0x363   :  { %3781 = vmatpush1.bf16.msra.mxu1 %v5174_v45  ;;  %v5254_v45 = vld [vmem:[#allocation11 + $0xd34] ss:$24 sps:$4 sm:$0xff]  }
 0x364   :  { %3782 = vmatprep.subr.bf16.mxu1 %v5182_v41 }
 0x365   :  { %3847 = vmatpush1.bf16.msra.mxu0 %v5177_v54  ;;  %v5249_v54 = vld [vmem:[#allocation11 + $0xb80] ss:$24 sps:$4 sm:$0xff]  }
 0x366   :  { %3848 = vmatprep.subr.bf16.mxu0 %v5185_v46 }
 0x367   :  { %3783 = vmatpush1.bf16.msra.mxu1 %v5180_v47 }
 0x368   :  { %3784 = vmatprep.subr.bf16.mxu1 %v5188_v48  ;;  %v5257_v48 = vld [vmem:[#allocation11 + $0xbb4] ss:$24 sps:$4 sm:$0xff]  }
 0x369   :  { %3849 = vmatpush1.bf16.msra.mxu0 %v5183_v49 }
 0x36a   :  { %3850 = vmatprep.subr.bf16.mxu0 %v5191_v50 }
 0x36b   :  { %3785 = vmatpush1.bf16.msra.mxu1 %v5186_v52  ;;  %v5252_v52 = vld [vmem:[#allocation11 + $0xd30] ss:$24 sps:$4 sm:$0xff]  }
 0x36c   :  { %3786 = vmatprep.subr.bf16.mxu1 %v5194_v2 }
 0x36d   :  { %3851 = vmatpush1.bf16.msra.mxu0 %v5189_v55 }
 0x36e   :  { %3852 = vmatprep.subr.bf16.mxu0 %v5197_v56  ;;  %v5260_v56 = vld [vmem:[#allocation11 + $0xd64] ss:$24 sps:$4 sm:$0xff]  }
 0x36f   :  { %3787 = vmatpush1.bf16.msra.mxu1 %v5192_v39 }
 0x370   :  { %3788 = vmatprep.subr.bf16.mxu1 %v5200_v1  ;;  %v5255_v1 = vld [vmem:[#allocation11 + $0xbb0] ss:$24 sps:$4 sm:$0xff]  }
 0x371   :  { %3853 = vmatpush1.bf16.msra.mxu0 %v5195_v60  ;;  %v5263_v60 = vld [vmem:[#allocation11 + $0xbe4] ss:$24 sps:$4 sm:$0xff]  }
 0x372   :  { %3854 = vmatprep.subr.bf16.mxu0 %v5203_v57  ;;  %v5261_v57 = vld [vmem:[#allocation11 + $0xbe0] ss:$24 sps:$4 sm:$0xff]  }
 0x373   :  { %v5821_v63 = vpop.f32.mrb[20].mxu0  ;;  %3789 = vmatpush1.bf16.msra.mxu1 %v5198_v0 }
 0x374   :  { %v5823_v8 = vpop.f32.mrb[21].mxu0  ;;  %3790 = vmatprep.subr.bf16.mxu1 %v5206_v58 }
 0x375   :  { %v2649_v10 = vpop.f32.mrb[22].mxu0  ;;  %3855 = vmatpush1.bf16.msra.mxu0 %v5201_v61 }
 0x376   :  { %v2650_v11 = vpop.f32.mrb[23].mxu0  ;;  %3856 = vmatprep.subr.bf16.mxu0 %v5209_v62 }
 0x377   :  { %3791 = vmatpush1.bf16.msra.mxu1 %v5204_v7 }
 0x378   :  { %3792 = vmatprep.subr.bf16.mxu1 %v5212_v59 }
 0x379   :  { %3857 = vmatpush1.bf16.msra.mxu0 %v5207_v6 }
 0x37a   :  { %3858 = vmatprep.subr.bf16.mxu0 %v5215_v17 }
 0x37b   :  { %3793 = vmatpush1.bf16.msra.mxu1 %v5210_v14 }
 0x37c   :  { %3885 = vmatprep.subr.bf16.mxu1 %v5218_v19 }
 0x37d   :  { %3859 = vmatpush1.bf16.msra.mxu0 %v5213_v20 }
 0x37e   :  { %3795 = vmatmul.mubr.bf16.vlgmr.msra.gmra.mrb[36].mxu1 %v5809_v53  ;;  %3860 = vmatprep.subr.bf16.mxu0 %v5221_v21 }
 0x37f   :  { %3886 = vmatpush1.bf16.msra.mxu1 %v5216_v24  ;;  %3917 = vmatprep.mubr.bf16.mxu1 %v5484_v31  ;;  %v5237_v31 = vld [vmem:[#allocation11 + $0xb20] ss:$24 sps:$4 sm:$0xff]  }
 0x380   :  { %3887 = vmatprep.subr.bf16.mxu1 %v5224_v33 }
 0x381   :  { %3861 = vmatpush1.bf16.msra.mxu0 %v5219_v26 }
 0x382   :  { %3862 = vmatprep.subr.bf16.mxu0 %v5227_v28 }
 0x383   :  { %3888 = vmatpush1.bf16.msra.mxu1 %v5222_v13  ;;  %v5841_v13 = vld [vmem:[#allocation13] sm:$0x3f] }
 0x384   :  { %3889 = vmatprep.subr.bf16.mxu1 %v5230_v15 }
 0x385   :  { %3863 = vmatpush1.bf16.msra.mxu0 %v5225_v16 }
 0x386   :  { %3864 = vmatprep.subr.bf16.mxu0 %v5233_v29 }
 0x387   :  { %3890 = vmatpush1.bf16.msra.mxu1 %v5228_v36 }
 0x388   :  { %3891 = vmatprep.subr.bf16.mxu1 %v5236_v37  ;;  %v3937_v37 = vrot.slane %v5841_v13, %v5640_v4 }
 0x389   :  { %3865 = vmatpush1.bf16.msra.mxu0 %v5231_v38 }
 0x38a   :  { %3866 = vmatprep.subr.bf16.mxu0 %v5239_v18  ;;  %v5845_v18 = vld [vmem:[#allocation14] sm:$0x3f] }
 0x38b   :  { %3892 = vmatpush1.bf16.msra.mxu1 %v5234_v22  ;;  %v3941_v22 = vrot.slane %v5841_v13, %v5643_v5 }
 0x38c   :  { %3893 = vmatprep.subr.bf16.mxu1 %v5242_v25 }
 0x38d   :  { %3867 = vmatpush1.bf16.msra.mxu0 %v5237_v31 }
 0x38e   :  { %3868 = vmatprep.subr.bf16.mxu0 %v5245_v40 }
 0x38f   :  { %3894 = vmatpush1.bf16.msra.mxu1 %v5240_v30 }
 0x390   :  { %3895 = vmatprep.subr.bf16.mxu1 %v5248_v43 }
 0x391   :  { %v2604_v41 = vpop.f32.mrb[20].mxu1  ;;  %3869 = vmatpush1.bf16.msra.mxu0 %v5243_v32  ;;  %v3981_v32 = vrot.slane %v5845_v18, %v5640_v4  ;;  %v3944_v4 = vsub.s32 2, %v5637_v3 }
 0x392   :  { %v2605_v46 = vadd.f32 %v2604_v41, %v5781_v23  ;;  %v2606_v47 = vpop.f32.mrb[21].mxu1  ;;  %3870 = vmatprep.subr.bf16.mxu0 %v5251_v34  ;;  %v5258_v23 = vld [vmem:[#allocation11 + $0xd60] ss:$24 sps:$4 sm:$0xff]  }
 0x393   :  { %v2607_v49 = vadd.f32 %v2606_v47, %v5783_v27  ;;  %v2608_v50 = vpop.f32.mrb[22].mxu1  ;;  %3896 = vmatpush1.bf16.msra.mxu1 %v5246_v9  ;;  %v3985_v9 = vrot.slane %v5845_v18, %v5643_v5 }
 0x394   :  { %v2646_v2 = vadd.f32 %v5821_v63, %v2605_v46  ;;  %v2609_v55 = vpop.f32.mrb[23].mxu1  ;;  %3897 = vmatprep.subr.bf16.mxu1 %v5254_v45 }
 0x395   :  { %v2648_v39 = vadd.f32 %v5823_v8, %v2607_v49  ;;  %3871 = vmatpush1.bf16.msra.mxu0 %v5249_v54 }
 0x396   :  { %3872 = vmatprep.subr.bf16.mxu0 %v5257_v48 }
 0x397   :  { %3898 = vmatpush1.bf16.msra.mxu1 %v5252_v52 }
 0x398   :  { %3899 = vmatprep.subr.bf16.mxu1 %v5260_v56  ;;  %v3948_v56 = vsub.s32 3, %v5637_v3 }
 0x399   :  { %3873 = vmatpush1.bf16.msra.mxu0 %v5255_v1  ;;  %v3945_v1 = vrot.slane %v5841_v13, %v3944_v4 }
 0x39a   :  { %3874 = vmatprep.subr.bf16.mxu0 %v5263_v60 }
 0x39b   :  { %3900 = vmatpush1.bf16.msra.mxu1 %v5258_v23 }
 0x39d   :  { %3875 = vmatpush1.bf16.msra.mxu0 %v5261_v57  ;;  %v3949_v57 = vrot.slane %v5841_v13, %v3948_v56 }
 0x39e   :  { %3918 = vmatmul.mubr.bf16.vlgmr.msra.gmra.mrb[40].mxu1 %v5805_v51 }
 0x3a0   :  { %3877 = vmatmul.mubr.bf16.vlgmr.msra.gmra.mrb[40].mxu0 %v5809_v53 }
 0x3b1   :  { %v2727_v27 = vpop.f32.mrb[24].mxu1 }
 0x3b2   :  { %v2729_v0 = vpop.f32.mrb[25].mxu1 }
 0x3b3   :  { %v2686_v58 = vpop.f32.mrb[24].mxu0  ;;  %v2731_v61 = vpop.f32.mrb[26].mxu1 }
 0x3b4   :  { %v2687_v62 = vadd.f32 %v2686_v58, %v5798_v42  ;;  %v2688_v63 = vpop.f32.mrb[25].mxu0  ;;  %v2732_v7 = vpop.f32.mrb[27].mxu1 }
 0x3b5   :  { %v2689_v8 = vadd.f32 %v2688_v63, %v5801_v44  ;;  %v2690_v59 = vpop.f32.mrb[26].mxu0  ;;  %v3989_v63 = vrot.slane %v5845_v18, %v3944_v4 }
 0x3b6   :  { %v2728_v10 = vadd.f32 %v2727_v27, %v2687_v62  ;;  %v2691_v6 = vpop.f32.mrb[27].mxu0 }
 0x3b7   :  { %v2730_v11 = vadd.f32 %v2729_v0, %v2689_v8  ;;  %v3993_v8 = vrot.slane %v5845_v18, %v3948_v56 }
 0x3d3   :  { %v2809_v17 = vpop.f32.mrb[28].mxu0 }
 0x3d4   :  { %v2811_v14 = vpop.f32.mrb[29].mxu0 }
 0x3d5   :  { %v2813_v19 = vpop.f32.mrb[30].mxu0 }
 0x3d6   :  { %v2814_v51 = vpop.f32.mrb[31].mxu0 }
 0x3f1   :  { %v2768_v20 = vpop.f32.mrb[28].mxu1 }
 0x3f2   :  { %v2769_v53 = vadd.f32 %v2768_v20, %v5815_v12  ;;  %v2770_v21 = vpop.f32.mrb[29].mxu1 }
 0x3f3   :  { %v2771_v24 = vadd.f32 %v2770_v21, %v5817_v35  ;;  %v2772_v33 = vpop.f32.mrb[30].mxu1 }
 0x3f4   :  { %v5837_v42 = vadd.f32 %v2809_v17, %v2769_v53  ;;  %v2773_v26 = vpop.f32.mrb[31].mxu1 }
 0x3f5   :  { %v5839_v28 = vadd.f32 %v2811_v14, %v2771_v24 }
 0x411   :  { %v3755_v44 = vpop.f32.mrb[32].mxu1 }
 0x412   :  { %v3757_v15 = vpop.f32.mrb[33].mxu1 }
 0x413   :  { %v3714_v16 = vpop.f32.mrb[32].mxu0  ;;  %v3759_v29 = vpop.f32.mrb[34].mxu1 }
 0x414   :  { %v3756_v36 = vadd.f32 %v3755_v44, %v3714_v16  ;;  %v3716_v12 = vpop.f32.mrb[33].mxu0  ;;  %v3760_v38 = vpop.f32.mrb[35].mxu1 }
 0x415   :  { %v3758_v35 = vadd.f32 %v3757_v15, %v3716_v12  ;;  %v3718_v25 = vpop.f32.mrb[34].mxu0 }
 0x416   :  { %v3926_v31 = vadd.f32 %v3756_v36, %v2646_v2  ;;  %v3719_v40 = vpop.f32.mrb[35].mxu0 }
 0x417   :  { %v3927_v30 = vadd.f32 %v3758_v35, %v2648_v39 }
 0x418   :  { %v3964_v43 = vadd.f32 %v3937_v37, %v3926_v31 }
 0x419   :  { %v3965_v34 = vadd.f32 %v3941_v22, %v3927_v30 }
 0x41a   :  { %v3970_v45 = vmax.f32 %v3964_v43, 0.0 }
 0x41b   :  { %v3971_v41 = vmax.f32 %v3965_v34, 0.0 }
 0x41c   :  { %v4008_v54 = vmul.f32 %v3981_v32, %v3970_v45 }
 0x41d   :  { %v4009_v46 = vmul.f32 %v3985_v9, %v3971_v41 }
 0x41e   :  { %v4015_v47 = vsel %vm4014_vm7, %v4008_v54, 0.0 }
 0x41f   :  { %v4016_v48 = vsel %vm4014_vm7, %v4009_v46, 0.0 }
 0x420   :  { %v4017_v49 = vadd.f32 %v4016_v48, %v4015_v47 }
 0x433   :  { %v3837_v50 = vpop.f32.mrb[36].mxu0 }
 0x434   :  { %v3839_v52 = vpop.f32.mrb[37].mxu0 }
 0x435   :  { %v3841_v2 = vpop.f32.mrb[38].mxu0 }
 0x436   :  { %v3842_v55 = vpop.f32.mrb[39].mxu0 }
 0x451   :  { %v3796_v39 = vpop.f32.mrb[36].mxu1 }
 0x452   :  { %v3838_v5 = vadd.f32 %v3837_v50, %v3796_v39  ;;  %v3798_v60 = vpop.f32.mrb[37].mxu1 }
 0x453   :  { %v3840_v23 = vadd.f32 %v3839_v52, %v3798_v60  ;;  %v3800_v27 = vpop.f32.mrb[38].mxu1 }
 0x454   :  { %v3928_v0 = vadd.f32 %v3838_v5, %v2728_v10  ;;  %v3801_v58 = vpop.f32.mrb[39].mxu1  ;;  %v3952_v10 = vsub.s32 4, %v5637_v3 }
 0x455   :  { %v3929_v61 = vadd.f32 %v3840_v23, %v2730_v11  ;;  %v3956_v11 = vsub.s32 5, %v5637_v3 }
 0x456   :  { %v3966_v62 = vadd.f32 %v3945_v1, %v3928_v0  ;;  %v3953_v15 = vrot.slane %v5841_v13, %v3952_v10  ;;  %v3997_v3 = vrot.slane %v5845_v18, %v3952_v10 }
 0x457   :  { %v3967_v7 = vadd.f32 %v3949_v57, %v3929_v61  ;;  %v3957_v37 = vrot.slane %v5841_v13, %v3956_v11  ;;  %v4001_v40 = vrot.slane %v5845_v18, %v3956_v11 }
 0x458   :  { %v3972_v59 = vmax.f32 %v3966_v62, 0.0 }
 0x459   :  { %v3973_v6 = vmax.f32 %v3967_v7, 0.0 }
 0x45a   :  { %v4010_v17 = vmul.f32 %v3989_v63, %v3972_v59 }
 0x45b   :  { %v4011_v14 = vmul.f32 %v3993_v8, %v3973_v6 }
 0x45c   :  { %v4018_v19 = vsel %vm4014_vm7, %v4010_v17, 0.0 }
 0x45d   :  { %v4019_v51 = vadd.f32 %v4018_v19, %v4017_v49  ;;  %v4020_v20 = vsel %vm4014_vm7, %v4011_v14, 0.0 }
 0x45f   :  { %v4021_v53 = vadd.f32 %v4020_v20, %v4019_v51 }
 0x471   :  { %v3919_v21 = vpop.f32.mrb[40].mxu1 }
 0x472   :  { %v3921_v24 = vpop.f32.mrb[41].mxu1 }
 0x473   :  { %v3878_v33 = vpop.f32.mrb[40].mxu0  ;;  %v3923_v26 = vpop.f32.mrb[42].mxu1 }
 0x474   :  { %v3920_v44 = vadd.f32 %v3919_v21, %v3878_v33  ;;  %v3880_v16 = vpop.f32.mrb[41].mxu0  ;;  %v3924_v29 = vpop.f32.mrb[43].mxu1 }
 0x475   :  { %v3922_v36 = vadd.f32 %v3921_v24, %v3880_v16  ;;  %v3882_v12 = vpop.f32.mrb[42].mxu0 }
 0x476   :  { %v3930_v38 = vadd.f32 %v3920_v44, %v5837_v42  ;;  %v3883_v35 = vpop.f32.mrb[43].mxu0  ;;  %v4509_v42 = vld [vmem:[#allocation2] ss:$0 sm:$0xff] }
 0x477   :  { %v3931_v22 = vadd.f32 %v3922_v36, %v5839_v28 }
 0x478   :  { %v3968_v25 = vadd.f32 %v3953_v15, %v3930_v38 }
 0x479   :  { %v3969_v31 = vadd.f32 %v3957_v37, %v3931_v22 }
 0x47a   :  { %v3974_v30 = vmax.f32 %v3968_v25, 0.0 }
 0x47b   :  { %v3975_v43 = vmax.f32 %v3969_v31, 0.0 }
 0x47c   :  { %v4012_v32 = vmul.f32 %v3997_v3, %v3974_v30 }
 0x47d   :  { %v4013_v34 = vmul.f32 %v4001_v40, %v3975_v43 }
 0x47e   :  { %v4022_v9 = vsel %vm4014_vm7, %v4012_v32, 0.0 }
 0x47f   :  { %v4023_v45 = vadd.f32 %v4022_v9, %v4021_v53  ;;  %v4024_v13 = vsel %vm4014_vm7, %v4013_v34, 0.0 }
 0x481   :  { %v4025_v41 = vadd.f32 %v4024_v13, %v4023_v45 }
 0x483   :  { %4026 = vadd.xlane.f32.xlu0 %v4025_v41 }
 0x510   :  { %v4027_v54 = vpop.xlane.xlu0 %4026 }
 0x511   :  { %v4035_v28 = vadd.f32 %v4509_v42, %v4027_v54 }
 0x513   :  { %v4510_v46 = vmul.f32 -1.442695, %v4035_v28 }
 0x515   :  { %5268 = vpow2.f32 %v4510_v46 }
 0x51f   :  { %v5269_v47 = vpop.eup %5268 }
 0x520   :  { %v4039_v48 = vadd.f32 1.0, %v5269_v47 }
 0x522   :  { %5270 = vrcp.f32 %v4039_v48 }
 0x52c   :  { %v5271_v18 = vpop.eup %5270 }
 0x52d   :  { %4043 = vst.msk [vmem:[%s5885_s9] sm:$0x3] %vm4042_vm8, %v5271_v18 }
 0x52e   :  { %4048 = vsyncpa [#allocation4], 1 }
 0x52f   :  { %4049 = vsyncpa [#allocation6], 1 }
 0x530   :  { %4050 = vsyncpa [#allocation9], 1 }
 0x531   :  { %4051 = vsyncpa [#allocation12], 1 }
 0x532   :  { %4052 = vsyncpa [#allocation15], 1 }

</bundles_post_ra>
